<compile_context>
chip_gen: v6e
topology: v6e:2x2x1
jax: 0.10.0
libtpu: 0.0.40
codegen_flags: <defaults>
</compile_context>

<pallas_src>
import functools
import math

import jax
import jax.numpy as jnp
import numpy as np
from jax.experimental import pallas as pl
from jax.experimental.pallas import tpu as pltpu


# ----------------------------- helpers -------------------------------------


def _layer_norm(x, gamma, beta, eps):
    # Matches LayerNormalization.forward: biased variance over the last dim.
    mean = jnp.mean(x, axis=-1, keepdims=True)
    var = jnp.mean((x - mean) ** 2, axis=-1, keepdims=True)
    return gamma * (x - mean) / jnp.sqrt(var + eps) + beta


# ------------------------- fused encoder kernel -----------------------------


def _encoder_kernel(x_ref, r_ref, spread_ref, bmask_ref,
                    wqkv_ref, bqkv_ref, wo_ref, bo_ref,
                    g1_ref, be1_ref, w1_ref, b1_ref, w2_ref, b2_ref,
                    g2_ref, be2_ref, out_ref,
                    *, num_layers, num_heads, head_dim, eps, mxu_dtype):
    H, hd = num_heads, head_dim
    D = H * hd
    scale = 1.0 / math.sqrt(hd)
    f32 = jnp.float32

    def mdot(a, b):                      # a @ b with f32 accumulation (MXU)
        return jnp.dot(a.astype(mxu_dtype), b.astype(mxu_dtype),
                       preferred_element_type=f32)

    def mdot_t(a, b):                    # a @ b.T (contract last dims)
        return jax.lax.dot_general(a.astype(mxu_dtype), b.astype(mxu_dtype),
                                   (((1,), (1,)), ((), ())),
                                   preferred_element_type=f32)

    x = x_ref[...]                       # (B*S, D) f32, batch folded into rows
    r_mat = r_ref[...]                   # (B*S, H*B*S) 0/1 row-scatter matrix
    spread = spread_ref[...]             # (H*B*S, D)   0/1 lane-block spread
    bmask = bmask_ref[...]               # (B*S, B*S)   0/1 block-diag batch mask

    for l in range(num_layers):
        # ---- fused QKV projection: ONE matmul per layer --------------------
        qkv = mdot(x, wqkv_ref[l]) + bqkv_ref[l]          # (B*S, 3D) = [Q|K|V]

        # per-head lane slices, each created once and consumed exactly once
        scores, v_heads = [], []
        for h in range(H):
            q_h = qkv[:, h * hd:(h + 1) * hd]
            k_h = qkv[:, D + h * hd:D + (h + 1) * hd]
            v_heads.append(qkv[:, 2 * D + h * hd:2 * D + (h + 1) * hd])
            scores.append(mdot_t(q_h, k_h) * scale)       # (B*S, B*S)

        # softmax over the HEAD axis (torch implicit dim=1 on a 4-D tensor)
        m = scores[0]
        for h in range(1, H):
            m = jnp.maximum(m, scores[h])
        exps = [jnp.exp(s - m) for s in scores]           # <= 1, always finite
        denom = exps[0]
        for h in range(1, H):
            denom = denom + exps[h]
        # reciprocal on the EUP; fold the block-diagonal batch mask in so
        # cross-batch attention weights are zeroed before P @ V.
        inv = pl.reciprocal(denom, approx=True) * bmask

        # per-head attention @ V over the whole batch at once
        av = [mdot(exps[h] * inv, v_heads[h]) for h in range(H)]   # (B*S, hd)

        # torch's `values.reshape(B, S, H*hd)` (contiguous, NO head transpose):
        # stack heads along rows, spread each row into its destination lane
        # block via a 0/1 mask, then scatter rows with ONE matmul.
        o_stack = jnp.concatenate(av, axis=0)                      # (H*B*S, hd)
        o_wide = jnp.concatenate([o_stack] * H, axis=1) * spread   # (H*B*S, D)
        vals = mdot(r_mat, o_wide)                                 # (B*S, D)

        # ---- single output projection over the whole batch -----------------
        attn_out = mdot(vals, wo_ref[l]) + bo_ref[l]

        # ---- add & norm, position-wise FFN, add & norm ----------------------
        x1 = _layer_norm(attn_out + x, g1_ref[l], be1_ref[l], eps)
        hmid = jnp.maximum(mdot(x1, w1_ref[l]) + b1_ref[l], 0.0)
        ffn = mdot(hmid, w2_ref[l]) + b2_ref[l]
        x = _layer_norm(ffn + x1, g2_ref[l], be2_ref[l], eps)

    out_ref[...] = x


# ------------------- host-side constant / weight preparation ----------------


def build_attention_constants(batch, seq, num_heads, head_dim):
    """Host-built 0/1 constants: (a) block-diagonal batch mask for the
    batch-folded scores, (b) spread mask + row-scatter matrix implementing
    torch's contiguous `values.reshape(B, S, H*hd)` (no head transpose)."""
    B, S, H, hd = batch, seq, num_heads, head_dim
    D, M = H * hd, batch * seq
    r_mat = np.zeros((M, H * M), np.float32)
    spread = np.zeros((H * M, D), np.float32)
    for h in range(H):
        for b in range(B):
            for s in range(S):
                j = h * M + b * S + s               # row in the head-stacked AV
                s_dst, k = divmod(h * S + s, H)     # torch reshape destination
                r_mat[b * S + s_dst, j] = 1.0
                spread[j, k * hd:(k + 1) * hd] = 1.0
    bmask = (np.arange(M)[:, None] // S) == (np.arange(M)[None, :] // S)
    return (jnp.asarray(r_mat), jnp.asarray(spread),
            jnp.asarray(bmask.astype(np.float32)))


def prepare_params(layer_params, num_heads):
    """Regroup fused-QKV rows to [Q|K|V] (head-major), transpose all weights to
    (in, out), reshape biases/LN params to (1, dim) rows, stack over layers."""
    D = layer_params[0]["wo"].shape[0]
    hd = D // num_heads
    heads = np.arange(num_heads)[:, None] * (3 * hd) + np.arange(hd)[None, :]
    perm = np.concatenate([(heads + off).reshape(-1) for off in (0, hd, 2 * hd)])

    def prep_one(p):
        wqkv = p["wqkv"][perm]          # (3D, D) rows regrouped [Q|K|V]
        bqkv = p["bqkv"][perm]
        return (
            wqkv.T, bqkv[None, :],               # fused (D, 3D) / (1, 3D)
            p["wo"].T, p["bo"][None, :],
            p["g1"][None, :], p["be1"][None, :],
            p["w1"].T, p["b1"][None, :],
            p["w2"].T, p["b2"][None, :],
            p["g2"][None, :], p["be2"][None, :],
        )

    per_layer = [prep_one(p) for p in layer_params]
    return tuple(jnp.stack([lay[i] for lay in per_layer], axis=0)
                 for i in range(len(per_layer[0])))


def encoder_forward(x, stacked_params, *, num_heads, eps=1e-5,
                    mxu_dtype=jnp.float32):
    """Whole encoder in one pallas_call. mxu_dtype=jnp.bfloat16 casts MXU
    operands to bf16 (f32 accumulation) as recommended for v6e/v7x; LayerNorm
    and softmax math stays in f32 either way."""
    B, S, D = x.shape
    num_layers = stacked_params[0].shape[0]
    hd = D // num_heads
    ffn_hidden = stacked_params[6].shape[-1]
    M = B * S

    r_mat, spread, bmask = build_attention_constants(B, S, num_heads, hd)
    kernel = functools.partial(
        _encoder_kernel, num_layers=num_layers, num_heads=num_heads,
        head_dim=hd, eps=eps, mxu_dtype=mxu_dtype)

    inputs = (x.reshape(M, D), r_mat, spread, bmask) + tuple(stacked_params)

    mm_flops = (2 * M * D * (3 * D)                  # fused QKV
                + 2 * num_heads * M * M * hd         # scores
                + 2 * num_heads * M * M * hd         # attention @ V
                + 2 * M * (num_heads * M) * D        # reshape-gather matmul
                + 2 * M * D * D                      # output projection
                + 4 * M * D * ffn_hidden)            # FFN (two matmuls)
    cost = pl.CostEstimate(
        flops=num_layers * mm_flops,
        transcendentals=num_layers * (num_heads + 1) * M * M,
        bytes_accessed=int(sum(int(np.prod(a.shape)) for a in inputs) * 4
                           + M * D * 4))

    vmem = pl.BlockSpec(memory_space=pltpu.MemorySpace.VMEM)
    out = pl.pallas_call(
        kernel,
        out_shape=jax.ShapeDtypeStruct((M, D), jnp.float32),
        in_specs=[vmem] * len(inputs),
        out_specs=vmem,
        cost_estimate=cost,
    )(*inputs)
    return out.reshape(B, S, D)


def init_layer_params(key, d_model, ffn_hidden):
    ks = jax.random.split(key, 8)
    s = 0.05
    f32 = jnp.float32
    return dict(
        wqkv=s * jax.random.normal(ks[0], (3 * d_model, d_model), f32),
        bqkv=s * jax.random.normal(ks[1], (3 * d_model,), f32),
        wo=s * jax.random.normal(ks[2], (d_model, d_model), f32),
        bo=s * jax.random.normal(ks[3], (d_model,), f32),
        w1=s * jax.random.normal(ks[4], (ffn_hidden, d_model), f32),
        b1=s * jax.random.normal(ks[5], (ffn_hidden,), f32),
        w2=s * jax.random.normal(ks[6], (d_model, ffn_hidden), f32),
        b2=s * jax.random.normal(ks[7], (d_model,), f32),
        g1=jnp.ones((d_model,), f32), be1=jnp.zeros((d_model,), f32),
        g2=jnp.ones((d_model,), f32), be2=jnp.zeros((d_model,), f32),
    )


# ------------------- pure-JAX reference (validation only) -------------------


def ref_encoder_forward(x, layer_params, num_heads, eps=1e-5):
    hp = jax.lax.Precision.HIGHEST
    B, S, D = x.shape
    H = num_heads
    hd = D // H
    for p in layer_params:
        qkv = jnp.einsum("bsd,od->bso", x, p["wqkv"], precision=hp) + p["bqkv"]
        qkv = qkv.reshape(B, S, H, 3 * hd).transpose(0, 2, 1, 3)
        q, k, v = jnp.split(qkv, 3, axis=-1)
        scaled = jnp.einsum("bhid,bhjd->bhij", q, k, precision=hp) / math.sqrt(hd)
        attn = jax.nn.softmax(scaled, axis=1)              # torch implicit dim=1
        vals = jnp.einsum("bhij,bhjd->bhid", attn, v, precision=hp)
        vals = vals.reshape(B, S, D)                       # no head transpose
        attn_out = jnp.einsum("bsd,od->bso", vals, p["wo"], precision=hp) + p["bo"]
        x1 = _layer_norm(attn_out + x, p["g1"], p["be1"], eps)
        hmid = jax.nn.relu(
            jnp.einsum("bsd,hd->bsh", x1, p["w1"], precision=hp) + p["b1"])
        ffn = jnp.einsum("bsh,dh->bsd", hmid, p["w2"], precision=hp) + p["b2"]
        x = _layer_norm(ffn + x1, p["g2"], p["be2"], eps)
    return x


if __name__ == "__main__":
    # Encoder(d_model=32, max_sequence_len=8, num_heads=4, ffn_hidden=64,
    #         drop_prob=0.01, num_layers=2)
    d_model, seq_len, num_heads, ffn_hidden, num_layers = 32, 8, 4, 64, 2
    batch = 2

    key = jax.random.PRNGKey(0)
    k_x, k_p = jax.random.split(key)
    x = jax.random.normal(k_x, (batch, seq_len, d_model), jnp.float32)
    layer_params = [init_layer_params(k, d_model, ffn_hidden)
                    for k in jax.random.split(k_p, num_layers)]
    stacked = prepare_params(layer_params, num_heads)

    # f32 MXU operands (numerically faithful path).
    fwd = jax.jit(functools.partial(encoder_forward, num_heads=num_heads))
    out = fwd(x, stacked)
    jax.block_until_ready(out)
    assert out.shape == (batch, seq_len, d_model)

    ref = ref_encoder_forward(x, layer_params, num_heads)
    np.testing.assert_allclose(np.asarray(out), np.asarray(ref),
                               rtol=1e-2, atol=1e-2)

    # bf16 MXU operands + f32 accumulation (v6e/v7x recommendation).
    fwd_bf16 = jax.jit(functools.partial(encoder_forward, num_heads=num_heads,
                                         mxu_dtype=jnp.bfloat16))
    out_bf16 = fwd_bf16(x, stacked)
    jax.block_until_ready(out_bf16)
    np.testing.assert_allclose(np.asarray(out_bf16), np.asarray(ref),
                               rtol=5e-2, atol=5e-2)

    print("KERNEL_OK")
</pallas_src>

<mosaic_0001>
module attributes {stable_mosaic.version = 11 : i64} {
  func.func @_encoder_kernel(%arg0: memref<16x32xf32, #tpu.memory_space<vmem>>, %arg1: memref<16x64xf32, #tpu.memory_space<vmem>>, %arg2: memref<64x32xf32, #tpu.memory_space<vmem>>, %arg3: memref<16x16xf32, #tpu.memory_space<vmem>>, %arg4: memref<2x32x96xf32, #tpu.memory_space<vmem>>, %arg5: memref<2x1x96xf32, #tpu.memory_space<vmem>>, %arg6: memref<2x32x32xf32, #tpu.memory_space<vmem>>, %arg7: memref<2x1x32xf32, #tpu.memory_space<vmem>>, %arg8: memref<2x1x32xf32, #tpu.memory_space<vmem>>, %arg9: memref<2x1x32xf32, #tpu.memory_space<vmem>>, %arg10: memref<2x32x64xf32, #tpu.memory_space<vmem>>, %arg11: memref<2x1x64xf32, #tpu.memory_space<vmem>>, %arg12: memref<2x64x32xf32, #tpu.memory_space<vmem>>, %arg13: memref<2x1x32xf32, #tpu.memory_space<vmem>>, %arg14: memref<2x1x32xf32, #tpu.memory_space<vmem>>, %arg15: memref<2x1x32xf32, #tpu.memory_space<vmem>>, %arg16: memref<16x32xf32, #tpu.memory_space<vmem>>) attributes {dimension_semantics = [], scalar_prefetch = 0 : i64, scratch_operands = 0 : i64, tpu.core_type = #tpu.core_type<tc>} {
    %c0 = arith.constant 0 : index
    %c0_0 = arith.constant 0 : index
    %0 = vector.load %arg0[%c0, %c0_0] : memref<16x32xf32, #tpu.memory_space<vmem>>, vector<16x32xf32>
    %c0_1 = arith.constant 0 : index
    %c0_2 = arith.constant 0 : index
    %1 = vector.load %arg1[%c0_1, %c0_2] : memref<16x64xf32, #tpu.memory_space<vmem>>, vector<16x64xf32>
    %c0_3 = arith.constant 0 : index
    %c0_4 = arith.constant 0 : index
    %2 = vector.load %arg2[%c0_3, %c0_4] : memref<64x32xf32, #tpu.memory_space<vmem>>, vector<64x32xf32>
    %c0_5 = arith.constant 0 : index
    %c0_6 = arith.constant 0 : index
    %3 = vector.load %arg3[%c0_5, %c0_6] : memref<16x16xf32, #tpu.memory_space<vmem>>, vector<16x16xf32>
    %c0_7 = arith.constant 0 : index
    %c0_8 = arith.constant 0 : index
    %c0_9 = arith.constant 0 : index
    %4 = vector.load %arg4[%c0_7, %c0_8, %c0_9] : memref<2x32x96xf32, #tpu.memory_space<vmem>>, vector<1x32x96xf32>
    %5 = vector.shape_cast %4 : vector<1x32x96xf32> to vector<32x96xf32>
    %cst = arith.constant dense<0.000000e+00> : vector<16x96xf32>
    %6 = tpu.matmul %0, %5, %cst {dimension_numbers = #tpu.dot_dimension_numbers<[1], [0], [0], [1], [0, 0, 1, 1], [], []>} : vector<16x32xf32>, vector<32x96xf32>, vector<16x96xf32> -> vector<16x96xf32>
    %c0_10 = arith.constant 0 : index
    %c0_11 = arith.constant 0 : index
    %c0_12 = arith.constant 0 : index
    %7 = vector.load %arg5[%c0_10, %c0_11, %c0_12] : memref<2x1x96xf32, #tpu.memory_space<vmem>>, vector<1x1x96xf32>
    %8 = vector.shape_cast %7 : vector<1x1x96xf32> to vector<1x96xf32>
    %9 = vector.broadcast %8 : vector<1x96xf32> to vector<16x96xf32>
    %10 = arith.addf %6, %9 : vector<16x96xf32>
    %11 = vector.extract_strided_slice %10 {offsets = [0, 0], sizes = [16, 8], strides = [1, 1]} : vector<16x96xf32> to vector<16x8xf32>
    %12 = vector.extract_strided_slice %10 {offsets = [0, 32], sizes = [16, 8], strides = [1, 1]} : vector<16x96xf32> to vector<16x8xf32>
    %13 = vector.extract_strided_slice %10 {offsets = [0, 64], sizes = [16, 8], strides = [1, 1]} : vector<16x96xf32> to vector<16x8xf32>
    %cst_13 = arith.constant dense<0.000000e+00> : vector<16x16xf32>
    %14 = tpu.matmul %11, %12, %cst_13 {dimension_numbers = #tpu.dot_dimension_numbers<[1], [1], [0], [0], [0, 0, 1, 0], [], []>} : vector<16x8xf32>, vector<16x8xf32>, vector<16x16xf32> -> vector<16x16xf32>
    %cst_14 = arith.constant 0.353553385 : f32
    %15 = vector.broadcast %cst_14 : f32 to vector<16x16xf32>
    %16 = arith.mulf %14, %15 : vector<16x16xf32>
    %17 = vector.extract_strided_slice %10 {offsets = [0, 8], sizes = [16, 8], strides = [1, 1]} : vector<16x96xf32> to vector<16x8xf32>
    %18 = vector.extract_strided_slice %10 {offsets = [0, 40], sizes = [16, 8], strides = [1, 1]} : vector<16x96xf32> to vector<16x8xf32>
    %19 = vector.extract_strided_slice %10 {offsets = [0, 72], sizes = [16, 8], strides = [1, 1]} : vector<16x96xf32> to vector<16x8xf32>
    %cst_15 = arith.constant dense<0.000000e+00> : vector<16x16xf32>
    %20 = tpu.matmul %17, %18, %cst_15 {dimension_numbers = #tpu.dot_dimension_numbers<[1], [1], [0], [0], [0, 0, 1, 0], [], []>} : vector<16x8xf32>, vector<16x8xf32>, vector<16x16xf32> -> vector<16x16xf32>
    %cst_16 = arith.constant 0.353553385 : f32
    %21 = vector.broadcast %cst_16 : f32 to vector<16x16xf32>
    %22 = arith.mulf %20, %21 : vector<16x16xf32>
    %23 = vector.extract_strided_slice %10 {offsets = [0, 16], sizes = [16, 8], strides = [1, 1]} : vector<16x96xf32> to vector<16x8xf32>
    %24 = vector.extract_strided_slice %10 {offsets = [0, 48], sizes = [16, 8], strides = [1, 1]} : vector<16x96xf32> to vector<16x8xf32>
    %25 = vector.extract_strided_slice %10 {offsets = [0, 80], sizes = [16, 8], strides = [1, 1]} : vector<16x96xf32> to vector<16x8xf32>
    %cst_17 = arith.constant dense<0.000000e+00> : vector<16x16xf32>
    %26 = tpu.matmul %23, %24, %cst_17 {dimension_numbers = #tpu.dot_dimension_numbers<[1], [1], [0], [0], [0, 0, 1, 0], [], []>} : vector<16x8xf32>, vector<16x8xf32>, vector<16x16xf32> -> vector<16x16xf32>
    %cst_18 = arith.constant 0.353553385 : f32
    %27 = vector.broadcast %cst_18 : f32 to vector<16x16xf32>
    %28 = arith.mulf %26, %27 : vector<16x16xf32>
    %29 = vector.extract_strided_slice %10 {offsets = [0, 24], sizes = [16, 8], strides = [1, 1]} : vector<16x96xf32> to vector<16x8xf32>
    %30 = vector.extract_strided_slice %10 {offsets = [0, 56], sizes = [16, 8], strides = [1, 1]} : vector<16x96xf32> to vector<16x8xf32>
    %31 = vector.extract_strided_slice %10 {offsets = [0, 88], sizes = [16, 8], strides = [1, 1]} : vector<16x96xf32> to vector<16x8xf32>
    %cst_19 = arith.constant dense<0.000000e+00> : vector<16x16xf32>
    %32 = tpu.matmul %29, %30, %cst_19 {dimension_numbers = #tpu.dot_dimension_numbers<[1], [1], [0], [0], [0, 0, 1, 0], [], []>} : vector<16x8xf32>, vector<16x8xf32>, vector<16x16xf32> -> vector<16x16xf32>
    %cst_20 = arith.constant 0.353553385 : f32
    %33 = vector.broadcast %cst_20 : f32 to vector<16x16xf32>
    %34 = arith.mulf %32, %33 : vector<16x16xf32>
    %35 = arith.maximumf %16, %22 : vector<16x16xf32>
    %36 = arith.maximumf %35, %28 : vector<16x16xf32>
    %37 = arith.maximumf %36, %34 : vector<16x16xf32>
    %38 = arith.subf %16, %37 : vector<16x16xf32>
    %39 = math.exp %38 : vector<16x16xf32>
    %40 = arith.subf %22, %37 : vector<16x16xf32>
    %41 = math.exp %40 : vector<16x16xf32>
    %42 = arith.subf %28, %37 : vector<16x16xf32>
    %43 = math.exp %42 : vector<16x16xf32>
    %44 = arith.subf %34, %37 : vector<16x16xf32>
    %45 = math.exp %44 : vector<16x16xf32>
    %46 = arith.addf %39, %41 : vector<16x16xf32>
    %47 = arith.addf %46, %43 : vector<16x16xf32>
    %48 = arith.addf %47, %45 : vector<16x16xf32>
    %49 = tpu.reciprocal %48 {approx = true} : vector<16x16xf32> -> vector<16x16xf32>
    %50 = arith.mulf %49, %3 : vector<16x16xf32>
    %51 = arith.mulf %39, %50 : vector<16x16xf32>
    %cst_21 = arith.constant dense<0.000000e+00> : vector<16x8xf32>
    %52 = tpu.matmul %51, %13, %cst_21 {dimension_numbers = #tpu.dot_dimension_numbers<[1], [0], [0], [1], [0, 0, 1, 1], [], []>} : vector<16x16xf32>, vector<16x8xf32>, vector<16x8xf32> -> vector<16x8xf32>
    %53 = arith.mulf %41, %50 : vector<16x16xf32>
    %cst_22 = arith.constant dense<0.000000e+00> : vector<16x8xf32>
    %54 = tpu.matmul %53, %19, %cst_22 {dimension_numbers = #tpu.dot_dimension_numbers<[1], [0], [0], [1], [0, 0, 1, 1], [], []>} : vector<16x16xf32>, vector<16x8xf32>, vector<16x8xf32> -> vector<16x8xf32>
    %55 = arith.mulf %43, %50 : vector<16x16xf32>
    %cst_23 = arith.constant dense<0.000000e+00> : vector<16x8xf32>
    %56 = tpu.matmul %55, %25, %cst_23 {dimension_numbers = #tpu.dot_dimension_numbers<[1], [0], [0], [1], [0, 0, 1, 1], [], []>} : vector<16x16xf32>, vector<16x8xf32>, vector<16x8xf32> -> vector<16x8xf32>
    %57 = arith.mulf %45, %50 : vector<16x16xf32>
    %cst_24 = arith.constant dense<0.000000e+00> : vector<16x8xf32>
    %58 = tpu.matmul %57, %31, %cst_24 {dimension_numbers = #tpu.dot_dimension_numbers<[1], [0], [0], [1], [0, 0, 1, 1], [], []>} : vector<16x16xf32>, vector<16x8xf32>, vector<16x8xf32> -> vector<16x8xf32>
    %59 = tpu.concatenate %52, %54, %56, %58 in 0 : vector<16x8xf32>, vector<16x8xf32>, vector<16x8xf32>, vector<16x8xf32> -> vector<64x8xf32>
    %60 = tpu.concatenate %59, %59, %59, %59 in 1 : vector<64x8xf32>, vector<64x8xf32>, vector<64x8xf32>, vector<64x8xf32> -> vector<64x32xf32>
    %61 = arith.mulf %60, %2 : vector<64x32xf32>
    %cst_25 = arith.constant dense<0.000000e+00> : vector<16x32xf32>
    %62 = tpu.matmul %1, %61, %cst_25 {dimension_numbers = #tpu.dot_dimension_numbers<[1], [0], [0], [1], [0, 0, 1, 1], [], []>} : vector<16x64xf32>, vector<64x32xf32>, vector<16x32xf32> -> vector<16x32xf32>
    %c0_26 = arith.constant 0 : index
    %c0_27 = arith.constant 0 : index
    %c0_28 = arith.constant 0 : index
    %63 = vector.load %arg6[%c0_26, %c0_27, %c0_28] : memref<2x32x32xf32, #tpu.memory_space<vmem>>, vector<1x32x32xf32>
    %64 = vector.shape_cast %63 : vector<1x32x32xf32> to vector<32x32xf32>
    %cst_29 = arith.constant dense<0.000000e+00> : vector<16x32xf32>
    %65 = tpu.matmul %62, %64, %cst_29 {dimension_numbers = #tpu.dot_dimension_numbers<[1], [0], [0], [1], [0, 0, 1, 1], [], []>} : vector<16x32xf32>, vector<32x32xf32>, vector<16x32xf32> -> vector<16x32xf32>
    %c0_30 = arith.constant 0 : index
    %c0_31 = arith.constant 0 : index
    %c0_32 = arith.constant 0 : index
    %66 = vector.load %arg7[%c0_30, %c0_31, %c0_32] : memref<2x1x32xf32, #tpu.memory_space<vmem>>, vector<1x1x32xf32>
    %67 = vector.shape_cast %66 : vector<1x1x32xf32> to vector<1x32xf32>
    %68 = vector.broadcast %67 : vector<1x32xf32> to vector<16x32xf32>
    %69 = arith.addf %65, %68 : vector<16x32xf32>
    %70 = arith.addf %69, %0 : vector<16x32xf32>
    %c0_33 = arith.constant 0 : index
    %c0_34 = arith.constant 0 : index
    %c0_35 = arith.constant 0 : index
    %71 = vector.load %arg8[%c0_33, %c0_34, %c0_35] : memref<2x1x32xf32, #tpu.memory_space<vmem>>, vector<1x1x32xf32>
    %72 = vector.shape_cast %71 : vector<1x1x32xf32> to vector<1x32xf32>
    %c0_36 = arith.constant 0 : index
    %c0_37 = arith.constant 0 : index
    %c0_38 = arith.constant 0 : index
    %73 = vector.load %arg9[%c0_36, %c0_37, %c0_38] : memref<2x1x32xf32, #tpu.memory_space<vmem>>, vector<1x1x32xf32>
    %74 = vector.shape_cast %73 : vector<1x1x32xf32> to vector<1x32xf32>
    %cst_39 = arith.constant dense<0.000000e+00> : vector<16xf32>
    %75 = vector.multi_reduction <add>, %70, %cst_39 [1] : vector<16x32xf32> to vector<16xf32>
    %76 = vector.shape_cast %75 : vector<16xf32> to vector<16x1xf32>
    %cst_40 = arith.constant 3.200000e+01 : f32
    %77 = vector.broadcast %cst_40 : f32 to vector<16x1xf32>
    %78 = arith.divf %76, %77 : vector<16x1xf32>
    %79 = vector.broadcast %78 : vector<16x1xf32> to vector<16x32xf32>
    %80 = arith.subf %70, %79 : vector<16x32xf32>
    %81 = arith.mulf %80, %80 : vector<16x32xf32>
    %cst_41 = arith.constant dense<0.000000e+00> : vector<16xf32>
    %82 = vector.multi_reduction <add>, %81, %cst_41 [1] : vector<16x32xf32> to vector<16xf32>
    %83 = vector.shape_cast %82 : vector<16xf32> to vector<16x1xf32>
    %cst_42 = arith.constant 3.200000e+01 : f32
    %84 = vector.broadcast %cst_42 : f32 to vector<16x1xf32>
    %85 = arith.divf %83, %84 : vector<16x1xf32>
    %86 = vector.broadcast %78 : vector<16x1xf32> to vector<16x32xf32>
    %87 = arith.subf %70, %86 : vector<16x32xf32>
    %88 = vector.broadcast %72 : vector<1x32xf32> to vector<16x32xf32>
    %89 = arith.mulf %88, %87 : vector<16x32xf32>
    %cst_43 = arith.constant 9.99999974E-6 : f32
    %90 = vector.broadcast %cst_43 : f32 to vector<16x1xf32>
    %91 = arith.addf %85, %90 : vector<16x1xf32>
    %92 = math.sqrt %91 : vector<16x1xf32>
    %93 = vector.broadcast %92 : vector<16x1xf32> to vector<16x32xf32>
    %94 = arith.divf %89, %93 : vector<16x32xf32>
    %95 = vector.broadcast %74 : vector<1x32xf32> to vector<16x32xf32>
    %96 = arith.addf %94, %95 : vector<16x32xf32>
    %c0_44 = arith.constant 0 : index
    %c0_45 = arith.constant 0 : index
    %c0_46 = arith.constant 0 : index
    %97 = vector.load %arg10[%c0_44, %c0_45, %c0_46] : memref<2x32x64xf32, #tpu.memory_space<vmem>>, vector<1x32x64xf32>
    %98 = vector.shape_cast %97 : vector<1x32x64xf32> to vector<32x64xf32>
    %cst_47 = arith.constant dense<0.000000e+00> : vector<16x64xf32>
    %99 = tpu.matmul %96, %98, %cst_47 {dimension_numbers = #tpu.dot_dimension_numbers<[1], [0], [0], [1], [0, 0, 1, 1], [], []>} : vector<16x32xf32>, vector<32x64xf32>, vector<16x64xf32> -> vector<16x64xf32>
    %c0_48 = arith.constant 0 : index
    %c0_49 = arith.constant 0 : index
    %c0_50 = arith.constant 0 : index
    %100 = vector.load %arg11[%c0_48, %c0_49, %c0_50] : memref<2x1x64xf32, #tpu.memory_space<vmem>>, vector<1x1x64xf32>
    %101 = vector.shape_cast %100 : vector<1x1x64xf32> to vector<1x64xf32>
    %102 = vector.broadcast %101 : vector<1x64xf32> to vector<16x64xf32>
    %103 = arith.addf %99, %102 : vector<16x64xf32>
    %cst_51 = arith.constant 0.000000e+00 : f32
    %104 = vector.broadcast %cst_51 : f32 to vector<16x64xf32>
    %105 = arith.maximumf %103, %104 : vector<16x64xf32>
    %c0_52 = arith.constant 0 : index
    %c0_53 = arith.constant 0 : index
    %c0_54 = arith.constant 0 : index
    %106 = vector.load %arg12[%c0_52, %c0_53, %c0_54] : memref<2x64x32xf32, #tpu.memory_space<vmem>>, vector<1x64x32xf32>
    %107 = vector.shape_cast %106 : vector<1x64x32xf32> to vector<64x32xf32>
    %cst_55 = arith.constant dense<0.000000e+00> : vector<16x32xf32>
    %108 = tpu.matmul %105, %107, %cst_55 {dimension_numbers = #tpu.dot_dimension_numbers<[1], [0], [0], [1], [0, 0, 1, 1], [], []>} : vector<16x64xf32>, vector<64x32xf32>, vector<16x32xf32> -> vector<16x32xf32>
    %c0_56 = arith.constant 0 : index
    %c0_57 = arith.constant 0 : index
    %c0_58 = arith.constant 0 : index
    %109 = vector.load %arg13[%c0_56, %c0_57, %c0_58] : memref<2x1x32xf32, #tpu.memory_space<vmem>>, vector<1x1x32xf32>
    %110 = vector.shape_cast %109 : vector<1x1x32xf32> to vector<1x32xf32>
    %111 = vector.broadcast %110 : vector<1x32xf32> to vector<16x32xf32>
    %112 = arith.addf %108, %111 : vector<16x32xf32>
    %113 = arith.addf %112, %96 : vector<16x32xf32>
    %c0_59 = arith.constant 0 : index
    %c0_60 = arith.constant 0 : index
    %c0_61 = arith.constant 0 : index
    %114 = vector.load %arg14[%c0_59, %c0_60, %c0_61] : memref<2x1x32xf32, #tpu.memory_space<vmem>>, vector<1x1x32xf32>
    %115 = vector.shape_cast %114 : vector<1x1x32xf32> to vector<1x32xf32>
    %c0_62 = arith.constant 0 : index
    %c0_63 = arith.constant 0 : index
    %c0_64 = arith.constant 0 : index
    %116 = vector.load %arg15[%c0_62, %c0_63, %c0_64] : memref<2x1x32xf32, #tpu.memory_space<vmem>>, vector<1x1x32xf32>
    %117 = vector.shape_cast %116 : vector<1x1x32xf32> to vector<1x32xf32>
    %cst_65 = arith.constant dense<0.000000e+00> : vector<16xf32>
    %118 = vector.multi_reduction <add>, %113, %cst_65 [1] : vector<16x32xf32> to vector<16xf32>
    %119 = vector.shape_cast %118 : vector<16xf32> to vector<16x1xf32>
    %cst_66 = arith.constant 3.200000e+01 : f32
    %120 = vector.broadcast %cst_66 : f32 to vector<16x1xf32>
    %121 = arith.divf %119, %120 : vector<16x1xf32>
    %122 = vector.broadcast %121 : vector<16x1xf32> to vector<16x32xf32>
    %123 = arith.subf %113, %122 : vector<16x32xf32>
    %124 = arith.mulf %123, %123 : vector<16x32xf32>
    %cst_67 = arith.constant dense<0.000000e+00> : vector<16xf32>
    %125 = vector.multi_reduction <add>, %124, %cst_67 [1] : vector<16x32xf32> to vector<16xf32>
    %126 = vector.shape_cast %125 : vector<16xf32> to vector<16x1xf32>
    %cst_68 = arith.constant 3.200000e+01 : f32
    %127 = vector.broadcast %cst_68 : f32 to vector<16x1xf32>
    %128 = arith.divf %126, %127 : vector<16x1xf32>
    %129 = vector.broadcast %121 : vector<16x1xf32> to vector<16x32xf32>
    %130 = arith.subf %113, %129 : vector<16x32xf32>
    %131 = vector.broadcast %115 : vector<1x32xf32> to vector<16x32xf32>
    %132 = arith.mulf %131, %130 : vector<16x32xf32>
    %cst_69 = arith.constant 9.99999974E-6 : f32
    %133 = vector.broadcast %cst_69 : f32 to vector<16x1xf32>
    %134 = arith.addf %128, %133 : vector<16x1xf32>
    %135 = math.sqrt %134 : vector<16x1xf32>
    %136 = vector.broadcast %135 : vector<16x1xf32> to vector<16x32xf32>
    %137 = arith.divf %132, %136 : vector<16x32xf32>
    %138 = vector.broadcast %117 : vector<1x32xf32> to vector<16x32xf32>
    %139 = arith.addf %137, %138 : vector<16x32xf32>
    %c1 = arith.constant 1 : index
    %c0_70 = arith.constant 0 : index
    %c0_71 = arith.constant 0 : index
    %140 = vector.load %arg4[%c1, %c0_70, %c0_71] : memref<2x32x96xf32, #tpu.memory_space<vmem>>, vector<1x32x96xf32>
    %141 = vector.shape_cast %140 : vector<1x32x96xf32> to vector<32x96xf32>
    %cst_72 = arith.constant dense<0.000000e+00> : vector<16x96xf32>
    %142 = tpu.matmul %139, %141, %cst_72 {dimension_numbers = #tpu.dot_dimension_numbers<[1], [0], [0], [1], [0, 0, 1, 1], [], []>} : vector<16x32xf32>, vector<32x96xf32>, vector<16x96xf32> -> vector<16x96xf32>
    %c1_73 = arith.constant 1 : index
    %c0_74 = arith.constant 0 : index
    %c0_75 = arith.constant 0 : index
    %143 = vector.load %arg5[%c1_73, %c0_74, %c0_75] : memref<2x1x96xf32, #tpu.memory_space<vmem>>, vector<1x1x96xf32>
    %144 = vector.shape_cast %143 : vector<1x1x96xf32> to vector<1x96xf32>
    %145 = vector.broadcast %144 : vector<1x96xf32> to vector<16x96xf32>
    %146 = arith.addf %142, %145 : vector<16x96xf32>
    %147 = vector.extract_strided_slice %146 {offsets = [0, 0], sizes = [16, 8], strides = [1, 1]} : vector<16x96xf32> to vector<16x8xf32>
    %148 = vector.extract_strided_slice %146 {offsets = [0, 32], sizes = [16, 8], strides = [1, 1]} : vector<16x96xf32> to vector<16x8xf32>
    %149 = vector.extract_strided_slice %146 {offsets = [0, 64], sizes = [16, 8], strides = [1, 1]} : vector<16x96xf32> to vector<16x8xf32>
    %cst_76 = arith.constant dense<0.000000e+00> : vector<16x16xf32>
    %150 = tpu.matmul %147, %148, %cst_76 {dimension_numbers = #tpu.dot_dimension_numbers<[1], [1], [0], [0], [0, 0, 1, 0], [], []>} : vector<16x8xf32>, vector<16x8xf32>, vector<16x16xf32> -> vector<16x16xf32>
    %cst_77 = arith.constant 0.353553385 : f32
    %151 = vector.broadcast %cst_77 : f32 to vector<16x16xf32>
    %152 = arith.mulf %150, %151 : vector<16x16xf32>
    %153 = vector.extract_strided_slice %146 {offsets = [0, 8], sizes = [16, 8], strides = [1, 1]} : vector<16x96xf32> to vector<16x8xf32>
    %154 = vector.extract_strided_slice %146 {offsets = [0, 40], sizes = [16, 8], strides = [1, 1]} : vector<16x96xf32> to vector<16x8xf32>
    %155 = vector.extract_strided_slice %146 {offsets = [0, 72], sizes = [16, 8], strides = [1, 1]} : vector<16x96xf32> to vector<16x8xf32>
    %cst_78 = arith.constant dense<0.000000e+00> : vector<16x16xf32>
    %156 = tpu.matmul %153, %154, %cst_78 {dimension_numbers = #tpu.dot_dimension_numbers<[1], [1], [0], [0], [0, 0, 1, 0], [], []>} : vector<16x8xf32>, vector<16x8xf32>, vector<16x16xf32> -> vector<16x16xf32>
    %cst_79 = arith.constant 0.353553385 : f32
    %157 = vector.broadcast %cst_79 : f32 to vector<16x16xf32>
    %158 = arith.mulf %156, %157 : vector<16x16xf32>
    %159 = vector.extract_strided_slice %146 {offsets = [0, 16], sizes = [16, 8], strides = [1, 1]} : vector<16x96xf32> to vector<16x8xf32>
    %160 = vector.extract_strided_slice %146 {offsets = [0, 48], sizes = [16, 8], strides = [1, 1]} : vector<16x96xf32> to vector<16x8xf32>
    %161 = vector.extract_strided_slice %146 {offsets = [0, 80], sizes = [16, 8], strides = [1, 1]} : vector<16x96xf32> to vector<16x8xf32>
    %cst_80 = arith.constant dense<0.000000e+00> : vector<16x16xf32>
    %162 = tpu.matmul %159, %160, %cst_80 {dimension_numbers = #tpu.dot_dimension_numbers<[1], [1], [0], [0], [0, 0, 1, 0], [], []>} : vector<16x8xf32>, vector<16x8xf32>, vector<16x16xf32> -> vector<16x16xf32>
    %cst_81 = arith.constant 0.353553385 : f32
    %163 = vector.broadcast %cst_81 : f32 to vector<16x16xf32>
    %164 = arith.mulf %162, %163 : vector<16x16xf32>
    %165 = vector.extract_strided_slice %146 {offsets = [0, 24], sizes = [16, 8], strides = [1, 1]} : vector<16x96xf32> to vector<16x8xf32>
    %166 = vector.extract_strided_slice %146 {offsets = [0, 56], sizes = [16, 8], strides = [1, 1]} : vector<16x96xf32> to vector<16x8xf32>
    %167 = vector.extract_strided_slice %146 {offsets = [0, 88], sizes = [16, 8], strides = [1, 1]} : vector<16x96xf32> to vector<16x8xf32>
    %cst_82 = arith.constant dense<0.000000e+00> : vector<16x16xf32>
    %168 = tpu.matmul %165, %166, %cst_82 {dimension_numbers = #tpu.dot_dimension_numbers<[1], [1], [0], [0], [0, 0, 1, 0], [], []>} : vector<16x8xf32>, vector<16x8xf32>, vector<16x16xf32> -> vector<16x16xf32>
    %cst_83 = arith.constant 0.353553385 : f32
    %169 = vector.broadcast %cst_83 : f32 to vector<16x16xf32>
    %170 = arith.mulf %168, %169 : vector<16x16xf32>
    %171 = arith.maximumf %152, %158 : vector<16x16xf32>
    %172 = arith.maximumf %171, %164 : vector<16x16xf32>
    %173 = arith.maximumf %172, %170 : vector<16x16xf32>
    %174 = arith.subf %152, %173 : vector<16x16xf32>
    %175 = math.exp %174 : vector<16x16xf32>
    %176 = arith.subf %158, %173 : vector<16x16xf32>
    %177 = math.exp %176 : vector<16x16xf32>
    %178 = arith.subf %164, %173 : vector<16x16xf32>
    %179 = math.exp %178 : vector<16x16xf32>
    %180 = arith.subf %170, %173 : vector<16x16xf32>
    %181 = math.exp %180 : vector<16x16xf32>
    %182 = arith.addf %175, %177 : vector<16x16xf32>
    %183 = arith.addf %182, %179 : vector<16x16xf32>
    %184 = arith.addf %183, %181 : vector<16x16xf32>
    %185 = tpu.reciprocal %184 {approx = true} : vector<16x16xf32> -> vector<16x16xf32>
    %186 = arith.mulf %185, %3 : vector<16x16xf32>
    %187 = arith.mulf %175, %186 : vector<16x16xf32>
    %cst_84 = arith.constant dense<0.000000e+00> : vector<16x8xf32>
    %188 = tpu.matmul %187, %149, %cst_84 {dimension_numbers = #tpu.dot_dimension_numbers<[1], [0], [0], [1], [0, 0, 1, 1], [], []>} : vector<16x16xf32>, vector<16x8xf32>, vector<16x8xf32> -> vector<16x8xf32>
    %189 = arith.mulf %177, %186 : vector<16x16xf32>
    %cst_85 = arith.constant dense<0.000000e+00> : vector<16x8xf32>
    %190 = tpu.matmul %189, %155, %cst_85 {dimension_numbers = #tpu.dot_dimension_numbers<[1], [0], [0], [1], [0, 0, 1, 1], [], []>} : vector<16x16xf32>, vector<16x8xf32>, vector<16x8xf32> -> vector<16x8xf32>
    %191 = arith.mulf %179, %186 : vector<16x16xf32>
    %cst_86 = arith.constant dense<0.000000e+00> : vector<16x8xf32>
    %192 = tpu.matmul %191, %161, %cst_86 {dimension_numbers = #tpu.dot_dimension_numbers<[1], [0], [0], [1], [0, 0, 1, 1], [], []>} : vector<16x16xf32>, vector<16x8xf32>, vector<16x8xf32> -> vector<16x8xf32>
    %193 = arith.mulf %181, %186 : vector<16x16xf32>
    %cst_87 = arith.constant dense<0.000000e+00> : vector<16x8xf32>
    %194 = tpu.matmul %193, %167, %cst_87 {dimension_numbers = #tpu.dot_dimension_numbers<[1], [0], [0], [1], [0, 0, 1, 1], [], []>} : vector<16x16xf32>, vector<16x8xf32>, vector<16x8xf32> -> vector<16x8xf32>
    %195 = tpu.concatenate %188, %190, %192, %194 in 0 : vector<16x8xf32>, vector<16x8xf32>, vector<16x8xf32>, vector<16x8xf32> -> vector<64x8xf32>
    %196 = tpu.concatenate %195, %195, %195, %195 in 1 : vector<64x8xf32>, vector<64x8xf32>, vector<64x8xf32>, vector<64x8xf32> -> vector<64x32xf32>
    %197 = arith.mulf %196, %2 : vector<64x32xf32>
    %cst_88 = arith.constant dense<0.000000e+00> : vector<16x32xf32>
    %198 = tpu.matmul %1, %197, %cst_88 {dimension_numbers = #tpu.dot_dimension_numbers<[1], [0], [0], [1], [0, 0, 1, 1], [], []>} : vector<16x64xf32>, vector<64x32xf32>, vector<16x32xf32> -> vector<16x32xf32>
    %c1_89 = arith.constant 1 : index
    %c0_90 = arith.constant 0 : index
    %c0_91 = arith.constant 0 : index
    %199 = vector.load %arg6[%c1_89, %c0_90, %c0_91] : memref<2x32x32xf32, #tpu.memory_space<vmem>>, vector<1x32x32xf32>
    %200 = vector.shape_cast %199 : vector<1x32x32xf32> to vector<32x32xf32>
    %cst_92 = arith.constant dense<0.000000e+00> : vector<16x32xf32>
    %201 = tpu.matmul %198, %200, %cst_92 {dimension_numbers = #tpu.dot_dimension_numbers<[1], [0], [0], [1], [0, 0, 1, 1], [], []>} : vector<16x32xf32>, vector<32x32xf32>, vector<16x32xf32> -> vector<16x32xf32>
    %c1_93 = arith.constant 1 : index
    %c0_94 = arith.constant 0 : index
    %c0_95 = arith.constant 0 : index
    %202 = vector.load %arg7[%c1_93, %c0_94, %c0_95] : memref<2x1x32xf32, #tpu.memory_space<vmem>>, vector<1x1x32xf32>
    %203 = vector.shape_cast %202 : vector<1x1x32xf32> to vector<1x32xf32>
    %204 = vector.broadcast %203 : vector<1x32xf32> to vector<16x32xf32>
    %205 = arith.addf %201, %204 : vector<16x32xf32>
    %206 = arith.addf %205, %139 : vector<16x32xf32>
    %c1_96 = arith.constant 1 : index
    %c0_97 = arith.constant 0 : index
    %c0_98 = arith.constant 0 : index
    %207 = vector.load %arg8[%c1_96, %c0_97, %c0_98] : memref<2x1x32xf32, #tpu.memory_space<vmem>>, vector<1x1x32xf32>
    %208 = vector.shape_cast %207 : vector<1x1x32xf32> to vector<1x32xf32>
    %c1_99 = arith.constant 1 : index
    %c0_100 = arith.constant 0 : index
    %c0_101 = arith.constant 0 : index
    %209 = vector.load %arg9[%c1_99, %c0_100, %c0_101] : memref<2x1x32xf32, #tpu.memory_space<vmem>>, vector<1x1x32xf32>
    %210 = vector.shape_cast %209 : vector<1x1x32xf32> to vector<1x32xf32>
    %cst_102 = arith.constant dense<0.000000e+00> : vector<16xf32>
    %211 = vector.multi_reduction <add>, %206, %cst_102 [1] : vector<16x32xf32> to vector<16xf32>
    %212 = vector.shape_cast %211 : vector<16xf32> to vector<16x1xf32>
    %cst_103 = arith.constant 3.200000e+01 : f32
    %213 = vector.broadcast %cst_103 : f32 to vector<16x1xf32>
    %214 = arith.divf %212, %213 : vector<16x1xf32>
    %215 = vector.broadcast %214 : vector<16x1xf32> to vector<16x32xf32>
    %216 = arith.subf %206, %215 : vector<16x32xf32>
    %217 = arith.mulf %216, %216 : vector<16x32xf32>
    %cst_104 = arith.constant dense<0.000000e+00> : vector<16xf32>
    %218 = vector.multi_reduction <add>, %217, %cst_104 [1] : vector<16x32xf32> to vector<16xf32>
    %219 = vector.shape_cast %218 : vector<16xf32> to vector<16x1xf32>
    %cst_105 = arith.constant 3.200000e+01 : f32
    %220 = vector.broadcast %cst_105 : f32 to vector<16x1xf32>
    %221 = arith.divf %219, %220 : vector<16x1xf32>
    %222 = vector.broadcast %214 : vector<16x1xf32> to vector<16x32xf32>
    %223 = arith.subf %206, %222 : vector<16x32xf32>
    %224 = vector.broadcast %208 : vector<1x32xf32> to vector<16x32xf32>
    %225 = arith.mulf %224, %223 : vector<16x32xf32>
    %cst_106 = arith.constant 9.99999974E-6 : f32
    %226 = vector.broadcast %cst_106 : f32 to vector<16x1xf32>
    %227 = arith.addf %221, %226 : vector<16x1xf32>
    %228 = math.sqrt %227 : vector<16x1xf32>
    %229 = vector.broadcast %228 : vector<16x1xf32> to vector<16x32xf32>
    %230 = arith.divf %225, %229 : vector<16x32xf32>
    %231 = vector.broadcast %210 : vector<1x32xf32> to vector<16x32xf32>
    %232 = arith.addf %230, %231 : vector<16x32xf32>
    %c1_107 = arith.constant 1 : index
    %c0_108 = arith.constant 0 : index
    %c0_109 = arith.constant 0 : index
    %233 = vector.load %arg10[%c1_107, %c0_108, %c0_109] : memref<2x32x64xf32, #tpu.memory_space<vmem>>, vector<1x32x64xf32>
    %234 = vector.shape_cast %233 : vector<1x32x64xf32> to vector<32x64xf32>
    %cst_110 = arith.constant dense<0.000000e+00> : vector<16x64xf32>
    %235 = tpu.matmul %232, %234, %cst_110 {dimension_numbers = #tpu.dot_dimension_numbers<[1], [0], [0], [1], [0, 0, 1, 1], [], []>} : vector<16x32xf32>, vector<32x64xf32>, vector<16x64xf32> -> vector<16x64xf32>
    %c1_111 = arith.constant 1 : index
    %c0_112 = arith.constant 0 : index
    %c0_113 = arith.constant 0 : index
    %236 = vector.load %arg11[%c1_111, %c0_112, %c0_113] : memref<2x1x64xf32, #tpu.memory_space<vmem>>, vector<1x1x64xf32>
    %237 = vector.shape_cast %236 : vector<1x1x64xf32> to vector<1x64xf32>
    %238 = vector.broadcast %237 : vector<1x64xf32> to vector<16x64xf32>
    %239 = arith.addf %235, %238 : vector<16x64xf32>
    %cst_114 = arith.constant 0.000000e+00 : f32
    %240 = vector.broadcast %cst_114 : f32 to vector<16x64xf32>
    %241 = arith.maximumf %239, %240 : vector<16x64xf32>
    %c1_115 = arith.constant 1 : index
    %c0_116 = arith.constant 0 : index
    %c0_117 = arith.constant 0 : index
    %242 = vector.load %arg12[%c1_115, %c0_116, %c0_117] : memref<2x64x32xf32, #tpu.memory_space<vmem>>, vector<1x64x32xf32>
    %243 = vector.shape_cast %242 : vector<1x64x32xf32> to vector<64x32xf32>
    %cst_118 = arith.constant dense<0.000000e+00> : vector<16x32xf32>
    %244 = tpu.matmul %241, %243, %cst_118 {dimension_numbers = #tpu.dot_dimension_numbers<[1], [0], [0], [1], [0, 0, 1, 1], [], []>} : vector<16x64xf32>, vector<64x32xf32>, vector<16x32xf32> -> vector<16x32xf32>
    %c1_119 = arith.constant 1 : index
    %c0_120 = arith.constant 0 : index
    %c0_121 = arith.constant 0 : index
    %245 = vector.load %arg13[%c1_119, %c0_120, %c0_121] : memref<2x1x32xf32, #tpu.memory_space<vmem>>, vector<1x1x32xf32>
    %246 = vector.shape_cast %245 : vector<1x1x32xf32> to vector<1x32xf32>
    %247 = vector.broadcast %246 : vector<1x32xf32> to vector<16x32xf32>
    %248 = arith.addf %244, %247 : vector<16x32xf32>
    %249 = arith.addf %248, %232 : vector<16x32xf32>
    %c1_122 = arith.constant 1 : index
    %c0_123 = arith.constant 0 : index
    %c0_124 = arith.constant 0 : index
    %250 = vector.load %arg14[%c1_122, %c0_123, %c0_124] : memref<2x1x32xf32, #tpu.memory_space<vmem>>, vector<1x1x32xf32>
    %251 = vector.shape_cast %250 : vector<1x1x32xf32> to vector<1x32xf32>
    %c1_125 = arith.constant 1 : index
    %c0_126 = arith.constant 0 : index
    %c0_127 = arith.constant 0 : index
    %252 = vector.load %arg15[%c1_125, %c0_126, %c0_127] : memref<2x1x32xf32, #tpu.memory_space<vmem>>, vector<1x1x32xf32>
    %253 = vector.shape_cast %252 : vector<1x1x32xf32> to vector<1x32xf32>
    %cst_128 = arith.constant dense<0.000000e+00> : vector<16xf32>
    %254 = vector.multi_reduction <add>, %249, %cst_128 [1] : vector<16x32xf32> to vector<16xf32>
    %255 = vector.shape_cast %254 : vector<16xf32> to vector<16x1xf32>
    %cst_129 = arith.constant 3.200000e+01 : f32
    %256 = vector.broadcast %cst_129 : f32 to vector<16x1xf32>
    %257 = arith.divf %255, %256 : vector<16x1xf32>
    %258 = vector.broadcast %257 : vector<16x1xf32> to vector<16x32xf32>
    %259 = arith.subf %249, %258 : vector<16x32xf32>
    %260 = arith.mulf %259, %259 : vector<16x32xf32>
    %cst_130 = arith.constant dense<0.000000e+00> : vector<16xf32>
    %261 = vector.multi_reduction <add>, %260, %cst_130 [1] : vector<16x32xf32> to vector<16xf32>
    %262 = vector.shape_cast %261 : vector<16xf32> to vector<16x1xf32>
    %cst_131 = arith.constant 3.200000e+01 : f32
    %263 = vector.broadcast %cst_131 : f32 to vector<16x1xf32>
    %264 = arith.divf %262, %263 : vector<16x1xf32>
    %265 = vector.broadcast %257 : vector<16x1xf32> to vector<16x32xf32>
    %266 = arith.subf %249, %265 : vector<16x32xf32>
    %267 = vector.broadcast %251 : vector<1x32xf32> to vector<16x32xf32>
    %268 = arith.mulf %267, %266 : vector<16x32xf32>
    %cst_132 = arith.constant 9.99999974E-6 : f32
    %269 = vector.broadcast %cst_132 : f32 to vector<16x1xf32>
    %270 = arith.addf %264, %269 : vector<16x1xf32>
    %271 = math.sqrt %270 : vector<16x1xf32>
    %272 = vector.broadcast %271 : vector<16x1xf32> to vector<16x32xf32>
    %273 = arith.divf %268, %272 : vector<16x32xf32>
    %274 = vector.broadcast %253 : vector<1x32xf32> to vector<16x32xf32>
    %275 = arith.addf %273, %274 : vector<16x32xf32>
    %c0_133 = arith.constant 0 : index
    %c0_134 = arith.constant 0 : index
    %276 = vector.load %arg16[%c0_133, %c0_134] : memref<16x32xf32, #tpu.memory_space<vmem>>, vector<16x32xf32>
    tpu.vector_store %arg16[%c0_133, %c0_134], %275 {strides = array<i32>} : memref<16x32xf32, #tpu.memory_space<vmem>>, vector<16x32xf32>,
    return
  }
}

</mosaic_0001>

<bundles_post_ra>
// kernel: encoder_forward.1
= control target key start
LH: loop header
LB: loop body
LE: loop exit
PB: predicated region body
PF: predicated region fallthrough
CT: control target
= control target key end

     0   :  { %s4654_s0 = inlined_call_operand.hbm [shape: f32[16,32], index: 0, kind: input, shape index: {}]   ;;  %s4655_s1 = inlined_call_operand.hbm [shape: f32[16,64], index: 1, kind: input, shape index: {}]   ;;  %s4656_s2 = inlined_call_operand.hbm [shape: f32[64,32], index: 2, kind: input, shape index: {}]   ;;  %s4657_s3 = inlined_call_operand.vmem [shape: f32[16,16], index: 3, kind: input, shape index: {}]   ;;  %s4658_s4 = inlined_call_operand.vmem [shape: f32[2,32,96], index: 4, kind: input, shape index: {}]   ;;  %s4659_s5 = inlined_call_operand.vmem [shape: f32[2,1,96], index: 5, kind: input, shape index: {}]   ;;  %s4660_s6 = inlined_call_operand.vmem [shape: f32[2,32,32], index: 6, kind: input, shape index: {}]   ;;  %s4661_s7 = inlined_call_operand.hbm [shape: f32[2,1,32], index: 7, kind: input, shape index: {}]   ;;  %s4662_s8 = inlined_call_operand.hbm [shape: f32[2,1,32], index: 8, kind: input, shape index: {}]   ;;  %s4663_s9 = inlined_call_operand.hbm [shape: f32[2,1,32], index: 9, kind: input, shape index: {}]   ;;  %s4664_s10 = inlined_call_operand.vmem [shape: f32[2,32,64], index: 10, kind: input, shape index: {}]   ;;  %s4665_s11 = inlined_call_operand.hbm [shape: f32[2,1,64], index: 11, kind: input, shape index: {}]   ;;  %s4666_s12 = inlined_call_operand.vmem [shape: f32[2,64,32], index: 12, kind: input, shape index: {}]   ;;  %s4667_s13 = inlined_call_operand.hbm [shape: f32[2,1,32], index: 13, kind: input, shape index: {}]   ;;  %s4668_s14 = inlined_call_operand.vmem [shape: f32[2,1,32], index: 14, kind: input, shape index: {}]   ;;  %s4669_s15 = inlined_call_operand.hbm [shape: f32[2,1,32], index: 15, kind: input, shape index: {}]   ;;  %s4670_s16 = inlined_call_operand.hbm [shape: f32[16,32], index: 16, kind: output, shape index: {}]  }
   0x1   :  { %4671 = sst [smem:[#allocation24_spill]] %s4654_s0 }
   0x2   :  { %21 = vsyncpa [#allocation3], 0 }
   0x3   :  { %22 = vsyncpa [#allocation6], 0 }
   0x4   :  { %23 = vsyncpa [#allocation9], 0 }
   0x5   :  { %24 = vsyncpa [#allocation12], 0 }
   0x6   :  { %25 = vsyncpa [#allocation15], 0 }
   0x7   :  { %26 = vsyncpa [#allocation4], 0  ;;  %s3941_s21 = smov [#allocation5]   ;;  %s3942_s23 = smov [#allocation8]  }
   0x8   :  { %s44_s22 = sshll.u32 %s3941_s21, 4  ;;  %s76_s24 = sshll.u32 %s3942_s23, 4  ;;  %s45_s22 = int_to_ptr.vmem [resolvable:$true] %s44_s22  ;;  %s77_s24 = int_to_ptr.vmem [resolvable:$true] %s76_s24 }
   0x9   :  { %s3737_s25 = scalar_lea.vmem %s45_s22, 256  ;;  %p3742_p1 = scmp.lt.s32.totalorder %s45_s22, %s45_s22 }
   0xa   :  { %p3738_p0 = scmp.ne.s32.totalorder %s45_s22, %s3737_s25  ;;  %p3743_p2 = scmp.lt.s32.totalorder %s3737_s25, %s3737_s25 }
   0xc   :  { %p3744_p3 = por %p3743_p2, %p3742_p1 }
   0xe   :  { %p3745_p4 = pnand %p3744_p3, %p3738_p0 }
  0x10   :  { %3748 = shalt.err (!%p3745_p4)
}
  0x11   :  { %s3943_s26 = smov 128   ;;  %s3944_s27 = smov 8  }
  0x12   :  { %50 = dma.hbm_to_vmem [thread:$0]  %s4655_s1, 256, %s45_s22, [#allocation6], %s3943_s26, %s3943_s26, %s3944_s27  }
  0x13   :  { %s3757_s30 = scalar_lea.vmem %s77_s24, 32  ;;  %p3762_p6 = scmp.lt.s32.totalorder %s77_s24, %s77_s24 }
  0x14   :  { %p3758_p5 = scmp.ne.s32.totalorder %s77_s24, %s3757_s30  ;;  %p3763_p7 = scmp.lt.s32.totalorder %s3757_s30, %s3757_s30 }
  0x16   :  { %p3764_p8 = por %p3763_p7, %p3762_p6 }
  0x18   :  { %p3765_p9 = pnand %p3764_p8, %p3758_p5 }
  0x1a   :  { %3768 = shalt.err (!%p3765_p9)
}
  0x1b   :  { %s3945_s0 = smov 16   ;;  %s3946_s17 = smov 1  }
  0x1c   :  { %82 = dma.hbm_to_vmem [thread:$0]  %s4661_s7, 32, %s77_s24, [#allocation9], %s3945_s0, %s3945_s0, %s3946_s17  }
  0x1d   :  { %s3947_s20 = smov [#allocation11]   ;;  %s3948_s23 = smov [#allocation14]  }
  0x1e   :  { %s100_s21 = sshll.u32 %s3947_s20, 4  ;;  %s128_s1 = sshll.u32 %s3948_s23, 4  ;;  %s101_s21 = int_to_ptr.vmem [resolvable:$true] %s100_s21  ;;  %s129_s1 = int_to_ptr.vmem [resolvable:$true] %s128_s1 }
  0x1f   :  { %s3777_s22 = scalar_lea.vmem %s101_s21, 32  ;;  %p3782_p11 = scmp.lt.s32.totalorder %s101_s21, %s101_s21 }
  0x20   :  { %p3778_p10 = scmp.ne.s32.totalorder %s101_s21, %s3777_s22  ;;  %p3783_p12 = scmp.lt.s32.totalorder %s3777_s22, %s3777_s22 }
  0x22   :  { %p3784_p13 = por %p3783_p12, %p3782_p11 }
  0x24   :  { %p3785_p0 = pnand %p3784_p13, %p3778_p10 }
  0x26   :  { %3788 = shalt.err (!%p3785_p0)
}
  0x27   :  { %106 = dma.hbm_to_vmem [thread:$0]  %s4663_s9, 32, %s101_s21, [#allocation12], %s3945_s0, %s3945_s0, %s3946_s17  }
  0x28   :  { %s3797_s7 = scalar_lea.vmem %s129_s1, 32  ;;  %p3802_p2 = scmp.lt.s32.totalorder %s129_s1, %s129_s1 }
  0x29   :  { %p3798_p1 = scmp.ne.s32.totalorder %s129_s1, %s3797_s7  ;;  %p3803_p3 = scmp.lt.s32.totalorder %s3797_s7, %s3797_s7 }
  0x2b   :  { %p3804_p4 = por %p3803_p3, %p3802_p2 }
  0x2d   :  { %p3805_p5 = pnand %p3804_p4, %p3798_p1 }
  0x2f   :  { %3808 = shalt.err (!%p3805_p5)
}
  0x30   :  { %134 = dma.hbm_to_vmem [thread:$0]  %s4667_s13, 32, %s129_s1, [#allocation15], %s3945_s0, %s3945_s0, %s3946_s17  }
  0x31   :  { %s3949_s30 = smov [#allocation2]   ;;  %s3950_s19 = smov [#allocation7]  }
  0x32   :  { %s32_s18 = sshll.u32 %s3949_s30, 4  ;;  %s56_s20 = sshll.u32 %s3950_s19, 4  ;;  %s33_s18 = int_to_ptr.vmem [resolvable:$true] %s32_s18  ;;  %s57_s20 = int_to_ptr.vmem [resolvable:$true] %s56_s20 }
  0x33   :  { %s3817_s9 = scalar_lea.vmem %s33_s18, 256  ;;  %p3822_p7 = scmp.lt.s32.totalorder %s33_s18, %s33_s18 }
  0x34   :  { %p3818_p6 = scmp.ne.s32.totalorder %s33_s18, %s3817_s9  ;;  %p3823_p8 = scmp.lt.s32.totalorder %s3817_s9, %s3817_s9 }
  0x36   :  { %p3824_p9 = por %p3823_p8, %p3822_p7 }
  0x38   :  { %p3825_p10 = pnand %p3824_p9, %p3818_p6 }
  0x3a   :  { %3828 = shalt.err (!%p3825_p10)
}
  0x3b   :  { %s4672_s22 = sld [smem:[#allocation24_spill]]  ;;  %s3837_s13 = scalar_lea.vmem %s57_s20, 1024 }
  0x3c   :  { %p3838_p11 = scmp.ne.s32.totalorder %s57_s20, %s3837_s13  ;;  %p3842_p12 = scmp.lt.s32.totalorder %s57_s20, %s57_s20 }
  0x3d   :  { %p3843_p13 = scmp.lt.s32.totalorder %s3837_s13, %s3837_s13 }
  0x3f   :  { %p3844_p0 = por %p3843_p13, %p3842_p12 }
  0x41   :  { %38 = dma.hbm_to_vmem [thread:$0]  %s4672_s22, 256, %s33_s18, [#allocation3], %s3943_s26, %s3943_s26, %s3944_s27  }
  0x42   :  { %p3845_p1 = pnand %p3844_p0, %p3838_p11 }
  0x44   :  { %3848 = shalt.err (!%p3845_p1)
}
  0x45   :  { %62 = dma.hbm_to_vmem [thread:$0]  %s4656_s2, 1024, %s57_s20, [#allocation6], %s3943_s26, %s3943_s26, %s3944_s27  }
  0x46   :  { %s3951_s28 = smov [#allocation10]   ;;  %s3952_s24 = smov [#allocation13]  }
  0x47   :  { %s88_s7 = sshll.u32 %s3951_s28, 4  ;;  %s114_s29 = sshll.u32 %s3952_s24, 4  ;;  %s89_s7 = int_to_ptr.vmem [resolvable:$true] %s88_s7  ;;  %s115_s29 = int_to_ptr.vmem [resolvable:$true] %s114_s29 }
  0x48   :  { %s3857_s30 = scalar_lea.vmem %s89_s7, 32  ;;  %p3862_p3 = scmp.lt.s32.totalorder %s89_s7, %s89_s7 }
  0x49   :  { %p3858_p2 = scmp.ne.s32.totalorder %s89_s7, %s3857_s30  ;;  %p3863_p4 = scmp.lt.s32.totalorder %s3857_s30, %s3857_s30 }
  0x4b   :  { %p3864_p5 = por %p3863_p4, %p3862_p3 }
  0x4d   :  { %p3865_p6 = pnand %p3864_p5, %p3858_p2 }
  0x4f   :  { %3868 = shalt.err (!%p3865_p6)
}
  0x50   :  { %94 = dma.hbm_to_vmem [thread:$0]  %s4662_s8, 32, %s89_s7, [#allocation9], %s3945_s0, %s3945_s0, %s3946_s17  }
  0x51   :  { %s3877_s2 = scalar_lea.vmem %s115_s29, 32  ;;  %p3882_p8 = scmp.lt.s32.totalorder %s115_s29, %s115_s29 }
  0x52   :  { %p3878_p7 = scmp.ne.s32.totalorder %s115_s29, %s3877_s2  ;;  %p3883_p9 = scmp.lt.s32.totalorder %s3877_s2, %s3877_s2 }
  0x54   :  { %p3884_p10 = por %p3883_p9, %p3882_p8 }
  0x56   :  { %p3885_p11 = pnand %p3884_p10, %p3878_p7 }
  0x58   :  { %3888 = shalt.err (!%p3885_p11)
}
  0x59   :  { %120 = dma.hbm_to_vmem [thread:$0]  %s4665_s11, 32, %s115_s29, [#allocation12], %s3945_s0, %s3945_s0, %s3946_s17  }
  0x5a   :  { %s3953_s21 = smov [#allocation16]  }
  0x5b   :  { %s142_s23 = sshll.u32 %s3953_s21, 4  ;;  %s143_s23 = int_to_ptr.vmem [resolvable:$true] %s142_s23 }
  0x5c   :  { %s3897_s22 = scalar_lea.vmem %s143_s23, 32  ;;  %p3902_p13 = scmp.lt.s32.totalorder %s143_s23, %s143_s23 }
  0x5d   :  { %p3898_p12 = scmp.ne.s32.totalorder %s143_s23, %s3897_s22  ;;  %p3903_p0 = scmp.lt.s32.totalorder %s3897_s22, %s3897_s22 }
  0x5f   :  { %p3904_p1 = por %p3903_p0, %p3902_p13 }
  0x61   :  { %p3905_p2 = pnand %p3904_p1, %p3898_p12 }
  0x63   :  { %3908 = shalt.err (!%p3905_p2)
}
  0x64   :  { %148 = dma.hbm_to_vmem [thread:$0]  %s4669_s15, 32, %s143_s23, [#allocation15], %s3945_s0, %s3945_s0, %s3946_s17  }
  0x65   :  { %3929 = dma.done.wait [#allocation3], 256  }
  0x66   :  { %3930 = vsyncadd [#allocation3], 4294967040 }
  0x67   :  { %3931 = dma.done.wait [#allocation6], 1280  }
  0x68   :  { %3932 = vsyncadd [#allocation6], 4294966016 }
  0x69   :  { %3933 = dma.done.wait [#allocation9], 64  }
  0x6a   :  { %3934 = vsyncadd [#allocation9], 4294967232 }
  0x6b   :  { %3935 = dma.done.wait [#allocation12], 64  }
  0x6c   :  { %3936 = vsyncadd [#allocation12], 4294967232 }
  0x6d   :  { %3937 = dma.done.wait [#allocation15], 64  }
  0x6e   :  { %3938 = vsyncadd [#allocation15], 4294967232  ;;  %vm201_vm0 = vcmask 261120   ;;  %v193_v0 = vld [vmem:[%s4658_s4 + $0x18] sm:$0xff]  ;;  %v192_v1 = vld [vmem:[%s4658_s4 + $0x10] sm:$0xff]  ;;  %vm289_vm1 = vcmask 64512  }
  0x6f   :  { %3377 = vmatprep.subr.mxu1 %v193_v0  ;;  %v4112_v2 = vld [vmem:[#allocation2] sm:$0xff]  ;;  %v191_v3 = vld [vmem:[%s4658_s4 + $0x8] sm:$0xff]  ;;  %s3954_s18 = smov 120   ;;  %s3955_s19 = smov 96   ;;  %vm702_vm2 = vcmask 130048   ;;  %vm1164_vm3 = vcmask 523264  }
  0x70   :  { %3378 = vmatpush3.msra.mxu1 %v193_v0  ;;  %3385 = vmatprep.mubr.msk.f32.mxu1 %vm201_vm0, %v4112_v2  ;;  %v190_v4 = vld [vmem:[%s4658_s4] sm:$0xff]  ;;  %v4122_v5 = vld [vmem:[#allocation2 + $0x8] sm:$0xff]  ;;  %s3956_s2 = smov 112   ;;  %s3957_s20 = smov 88   ;;  %vm1147_vm4 = vcmask 195584  }
  0x71   :  { %3379 = vmatprep.subr.mxu1 %v192_v1  ;;  %v3131_v6 = vld [vmem:[%s4659_s5] ss:$0 sm:$0xff]  ;;  %s3958_s9 = smov 80   ;;  %s3959_s21 = smov 72  }
  0x72   :  { %3380 = vmatpush3.msra.mxu1 %v192_v1  ;;  %s3960_s23 = smov 104   ;;  %s3961_s22 = smov 64  }
  0x73   :  { %3381 = vmatprep.subr.mxu1 %v191_v3  ;;  %s3962_s8 = smov 56   ;;  %s3963_s13 = smov 40  }
  0x74   :  { %3382 = vmatpush3.msra.mxu1 %v191_v3  ;;  %s3964_s11 = smov 48  }
  0x75   :  { %3383 = vmatprep.subr.mxu1 %v190_v4 }
  0x76   :  { %3384 = vmatpush3.msra.mxu1 %v190_v4 }
  0x77   :  { %3386 = vmatmul.mubr.msk.f32.vlgmr.msra.gmra.mxu1 %vm201_vm0, %v4122_v5 }
 0x137   :  { %v3387_v7 = vpop.f32.mrf.mxu1 }
 0x138   :  { %v280_v8 = vadd.f32 %v3387_v7, %v3131_v6 }
 0x139   :  { %v274_v9 = vpop.f32.mrf.mxu1 }
 0x13a   :  { %v275_v10 = vadd.f32 %v3131_v6, %v274_v9  ;;  %377 = vrot.lane.b32.xlu1 %v280_v8, %s3954_s18  ;;  %287 = vrot.lane.b32.xlu0 %v280_v8, %s3955_s19 }
 0x13c   :  { %3392 = vmatprep.mubr.msk.f32.mxu1 %vm289_vm1, %v275_v10 }
 0x13e   :  { %470 = vrot.lane.b32.xlu1 %v280_v8, %s3956_s2  ;;  %381 = vrot.lane.b32.xlu0 %v280_v8, %s3957_s20 }
 0x142   :  { %474 = vrot.lane.b32.xlu0 %v280_v8, %s3958_s9  ;;  %285 = vrot.lane.b32.xlu1 %v275_v10, %s3955_s19 }
 0x146   :  { %567 = vrot.lane.b32.xlu0 %v280_v8, %s3959_s21  ;;  %379 = vrot.lane.b32.xlu1 %v275_v10, %s3957_s20 }
 0x14a   :  { %472 = vrot.lane.b32.xlu0 %v275_v10, %s3958_s9  ;;  %375 = vrot.lane.b32.xlu1 %v275_v10, %s3954_s18 }
 0x14e   :  { %468 = vrot.lane.b32.xlu0 %v275_v10, %s3956_s2  ;;  %565 = vrot.lane.b32.xlu1 %v275_v10, %s3959_s21 }
 0x152   :  { %561 = vrot.lane.b32.xlu0 %v275_v10, %s3960_s23  ;;  %563 = vrot.lane.b32.xlu1 %v280_v8, %s3960_s23 }
 0x156   :  { %698 = vrot.lane.b32.xlu0 %v280_v8, %s3961_s22  ;;  %696 = vrot.lane.b32.xlu1 %v275_v10, %s3961_s22 }
 0x15a   :  { %788 = vrot.lane.b32.xlu0 %v280_v8, %s3962_s8  ;;  %786 = vrot.lane.b32.xlu1 %v275_v10, %s3962_s8 }
 0x15e   :  { %966 = vrot.lane.b32.xlu0 %v280_v8, %s3963_s13  ;;  %964 = vrot.lane.b32.xlu1 %v275_v10, %s3963_s13 }
 0x162   :  { %877 = vrot.lane.b32.xlu0 %v280_v8, %s3964_s11  ;;  %875 = vrot.lane.b32.xlu1 %v275_v10, %s3964_s11 }
 0x1ac   :  { %v378_v11 = vpop.permute.xlu1 %377  ;;  %v288_v12 = vpop.permute.xlu0 %287 }
 0x1ad   :  { %3388 = vmatprep.subr.msk.mxu1 %vm289_vm1, %v288_v12 }
 0x1ae   :  { %3389 = vmatpush3.xpose.msk.msra.mxu1 %vm289_vm1, %v288_v12 }
 0x1b0   :  { %v471_v13 = vpop.permute.xlu1 %470  ;;  %v382_v14 = vpop.permute.xlu0 %381 }
 0x1b1   :  { %3395 = vmatprep.subr.msk.mxu0 %vm289_vm1, %v382_v14 }
 0x1b2   :  { %3396 = vmatpush3.xpose.msk.msra.mxu0 %vm289_vm1, %v382_v14 }
 0x1b4   :  { %v475_v15 = vpop.permute.xlu0 %474  ;;  %v286_v16 = vpop.permute.xlu1 %285 }
 0x1b5   :  { %3390 = vmatprep.subr.msk.mxu1 %vm289_vm1, %v286_v16 }
 0x1b6   :  { %3391 = vmatpush3.xpose.msk.msra.mxu1 %vm289_vm1, %v286_v16 }
 0x1b7   :  { %3402 = vmatprep.subr.msk.mxu1 %vm289_vm1, %v475_v15 }
 0x1b8   :  { %v568_v17 = vpop.permute.xlu0 %567  ;;  %v380_v18 = vpop.permute.xlu1 %379 }
 0x1b9   :  { %3393 = vmatmul.mubr.msk.f32.vlgmr.msra.gmra.mxu1 %vm289_vm1, %v280_v8  ;;  %3397 = vmatprep.subr.msk.mxu0 %vm289_vm1, %v380_v18 }
 0x1ba   :  { %3398 = vmatpush3.xpose.msk.msra.mxu0 %vm289_vm1, %v380_v18  ;;  %3403 = vmatpush3.xpose.msk.msra.mxu1 %vm289_vm1, %v475_v15 }
 0x1bb   :  { %3409 = vmatprep.subr.msk.mxu0 %vm289_vm1, %v568_v17 }
 0x1bc   :  { %v473_v19 = vpop.permute.xlu0 %472  ;;  %v376_v20 = vpop.permute.xlu1 %375 }
 0x1bd   :  { %3399 = vmatprep.mubr.msk.f32.mxu0 %vm289_vm1, %v376_v20  ;;  %3404 = vmatprep.subr.msk.mxu1 %vm289_vm1, %v473_v19 }
 0x1be   :  { %3400 = vmatmul.mubr.msk.f32.vlgmr.msra.gmra.mxu0 %vm289_vm1, %v378_v11  ;;  %3405 = vmatpush3.xpose.msk.msra.mxu1 %vm289_vm1, %v473_v19 }
 0x1bf   :  { %3410 = vmatpush3.xpose.msk.msra.mxu0 %vm289_vm1, %v568_v17 }
 0x1c0   :  { %v469_v21 = vpop.permute.xlu0 %468  ;;  %v566_v22 = vpop.permute.xlu1 %565 }
 0x1c1   :  { %3406 = vmatprep.mubr.msk.f32.mxu1 %vm289_vm1, %v469_v21  ;;  %3411 = vmatprep.subr.msk.mxu0 %vm289_vm1, %v566_v22 }
 0x1c2   :  { %3407 = vmatmul.mubr.msk.f32.vlgmr.msra.gmra.mxu1 %vm289_vm1, %v471_v13 }
 0x1c3   :  { %3412 = vmatpush3.xpose.msk.msra.mxu0 %vm289_vm1, %v566_v22 }
 0x1c4   :  { %v562_v23 = vpop.permute.xlu0 %561  ;;  %v564_v24 = vpop.permute.xlu1 %563 }
 0x1c5   :  { %3413 = vmatprep.mubr.msk.f32.mxu0 %vm289_vm1, %v562_v23 }
 0x1c6   :  { %3414 = vmatmul.mubr.msk.f32.vlgmr.msra.gmra.mxu0 %vm289_vm1, %v564_v24  ;;  %v4187_v24 = vld [vmem:[%s4657_s3 + $0x8] sm:$0xff] }
 0x1c8   :  { %v699_v25 = vpop.permute.xlu0 %698  ;;  %v697_v26 = vpop.permute.xlu1 %696 }
 0x1c9   :  { %3416 = vmatprep.subr.mxu1 %v699_v25 }
 0x1ca   :  { %3417 = vmatpush3.msra.mxu1 %v699_v25  ;;  %v4192_v25 = vld [vmem:[%s4657_s3] sm:$0xff]  ;;  %s3965_s3 = smov 24  }
 0x1cb   :  { %3418 = vmatprep.subr.mxu1 %v697_v26 }
 0x1cc   :  { %v4175_v27 = vpop.permute.xlu0 %788  ;;  %v4177_v28 = vpop.permute.xlu1 %786  ;;  %3419 = vmatpush3.msra.mxu1 %v697_v26 }
 0x1cd   :  { %3423 = vmatprep.subr.mxu1 %v4175_v27 }
 0x1d0   :  { %v4180_v29 = vpop.permute.xlu0 %966  ;;  %v4182_v30 = vpop.permute.xlu1 %964 }
 0x1d4   :  { %v878_v31 = vpop.permute.xlu0 %877  ;;  %v876_v32 = vpop.permute.xlu1 %875 }
 0x1d5   :  { %3430 = vmatprep.subr.mxu0 %v878_v31 }
 0x1d6   :  { %3431 = vmatpush3.msra.mxu0 %v878_v31 }
 0x1d7   :  { %3432 = vmatprep.subr.mxu0 %v876_v32 }
 0x1d8   :  { %3433 = vmatpush3.msra.mxu0 %v876_v32 }
 0x279   :  { %v3394_v33 = vpop.f32.mrf.mxu1 }
 0x27a   :  { %v374_v39 = vmul.f32 0.35355338, %v3394_v33 }
 0x27b   :  { %v364_v35 = vpop.f32.mrf.mxu1 }
 0x27c   :  { %v373_v44 = vmul.f32 0.35355338, %v364_v35 }
 0x27e   :  { %v3401_v34 = vpop.f32.mrf.mxu0 }
 0x27f   :  { %v467_v36 = vmul.f32 0.35355338, %v3401_v34 }
 0x280   :  { %v457_v37 = vpop.f32.mrf.mxu0 }
 0x281   :  { %v466_v41 = vmul.f32 0.35355338, %v457_v37  ;;  %v655_v43 = vmax.f32 %v374_v39, %v467_v36 }
 0x282   :  { %v3408_v38 = vpop.f32.mrf.mxu1 }
 0x283   :  { %v560_v40 = vmul.f32 0.35355338, %v3408_v38  ;;  %v654_v49 = vmax.f32 %v373_v44, %v466_v41 }
 0x284   :  { %v550_v42 = vpop.f32.mrf.mxu1 }
 0x285   :  { %v559_v45 = vmul.f32 0.35355338, %v550_v42  ;;  %v657_v47 = vmax.f32 %v655_v43, %v560_v40 }
 0x286   :  { %v3415_v46 = vpop.f32.mrf.mxu0 }
 0x287   :  { %v653_v48 = vmul.f32 0.35355338, %v3415_v46  ;;  %v656_v53 = vmax.f32 %v654_v49, %v559_v45  ;;  %v1249_v46 = vld [vmem:[%s4660_s6 + $0x18] sm:$0xff] }
 0x288   :  { %v643_v50 = vpop.f32.mrf.mxu0 }
 0x289   :  { %v659_v51 = vmax.f32 %v657_v47, %v653_v48  ;;  %v652_v52 = vmul.f32 0.35355338, %v643_v50  ;;  %v1248_v47 = vld [vmem:[%s4660_s6 + $0x10] sm:$0xff] }
 0x28b   :  { %v661_v54 = vsub.f32 %v374_v39, %v659_v51  ;;  %v667_v55 = vsub.f32 %v467_v36, %v659_v51  ;;  %v673_v56 = vsub.f32 %v560_v40, %v659_v51  ;;  %v679_v57 = vsub.f32 %v653_v48, %v659_v51 }
 0x28c   :  { %v658_v58 = vmax.f32 %v656_v53, %v652_v52 }
 0x28d   :  { %v664_v59 = vmul.f32 1.442695, %v661_v54  ;;  %v670_v60 = vmul.f32 1.442695, %v667_v55  ;;  %v676_v61 = vmul.f32 1.442695, %v673_v56 }
 0x28e   :  { %v682_v62 = vmul.f32 1.442695, %v679_v57  ;;  %v660_v63 = vsub.f32 %v373_v44, %v658_v58  ;;  %v666_v0 = vsub.f32 %v466_v41, %v658_v58  ;;  %v672_v1 = vsub.f32 %v559_v45, %v658_v58  ;;  %v4257_v45 = vld [vmem:[#allocation5] sm:$0xff] }
 0x28f   :  { %3657 = vpow2.f32 %v664_v59  ;;  %v678_v6 = vsub.f32 %v652_v52, %v658_v58 }
 0x290   :  { %3659 = vpow2.f32 %v670_v60  ;;  %v662_v3 = vmul.f32 1.442695, %v660_v63  ;;  %v668_v4 = vmul.f32 1.442695, %v666_v0  ;;  %v674_v7 = vmul.f32 1.442695, %v672_v1 }
 0x291   :  { %3661 = vpow2.f32 %v676_v61  ;;  %v680_v8 = vmul.f32 1.442695, %v678_v6  ;;  %v4276_v63 = vld [vmem:[#allocation7 + $0x38] sm:$0xff] }
 0x292   :  { %3663 = vpow2.f32 %v682_v62 }
 0x293   :  { %3665 = vpow2.f32 %v662_v3 }
 0x294   :  { %3667 = vpow2.f32 %v668_v4 }
 0x295   :  { %3669 = vpow2.f32 %v674_v7 }
 0x296   :  { %3671 = vpow2.f32 %v680_v8 }
 0x29c   :  { %v3658_v9 = vpop.eup %3657 }
 0x29d   :  { %v3660_v10 = vpop.eup %3659 }
 0x29e   :  { %v3662_v11 = vpop.eup %3661  ;;  %v685_v12 = vadd.f32 %v3660_v10, %v3658_v9 }
 0x29f   :  { %v3664_v13 = vpop.eup %3663 }
 0x2a0   :  { %v3666_v14 = vpop.eup %3665  ;;  %v687_v15 = vadd.f32 %v3662_v11, %v685_v12 }
 0x2a1   :  { %v3668_v16 = vpop.eup %3667 }
 0x2a2   :  { %v689_v17 = vadd.f32 %v3664_v13, %v687_v15  ;;  %v684_v18 = vadd.f32 %v3668_v16, %v3666_v14  ;;  %v3670_v19 = vpop.eup %3669  ;;  %v4290_v15 = vld [vmem:[#allocation7 + $0x28] sm:$0xff] }
 0x2a3   :  { %v3672_v21 = vpop.eup %3671 }
 0x2a4   :  { %v686_v20 = vadd.f32 %v3670_v19, %v684_v18  ;;  %3673 = vrcp.f32 %v689_v17 }
 0x2a6   :  { %v688_v22 = vadd.f32 %v3672_v21, %v686_v20 }
 0x2a8   :  { %3675 = vrcp.f32 %v688_v22 }
 0x2b1   :  { %v3674_v23 = vpop.eup %3673 }
 0x2b2   :  { %v693_v31 = vmul.f32 %v3674_v23, %v4187_v24 }
 0x2b4   :  { %v695_v35 = vmul.f32 %v3658_v9, %v693_v31  ;;  %v874_v36 = vmul.f32 %v3662_v11, %v693_v31  ;;  %v785_v38 = vmul.f32 %v3660_v10, %v693_v31  ;;  %v963_v40 = vmul.f32 %v3664_v13, %v693_v31  ;;  %v4284_v10 = vld [vmem:[#allocation7 + $0x30] sm:$0xff] }
 0x2b5   :  { %v3676_v26 = vpop.eup %3675 }
 0x2b6   :  { %v692_v32 = vmul.f32 %v3676_v26, %v4192_v25 }
 0x2b8   :  { %v694_v33 = vmul.f32 %v3666_v14, %v692_v32  ;;  %v873_v34 = vmul.f32 %v3670_v19, %v692_v32  ;;  %v784_v37 = vmul.f32 %v3668_v16, %v692_v32  ;;  %v962_v39 = vmul.f32 %v3672_v21, %v692_v32  ;;  %v4296_v21 = vld [vmem:[#allocation7 + $0x20] sm:$0xff] }
 0x2ba   :  { %3420 = vmatprep.mubr.msk.f32.mxu1 %vm702_vm2, %v694_v33  ;;  %3434 = vmatprep.mubr.msk.f32.mxu0 %vm702_vm2, %v873_v34  ;;  %v4305_v34 = vld [vmem:[#allocation7 + $0x18] sm:$0xff] }
 0x2bb   :  { %3421 = vmatmul.mubr.msk.f32.vlgmr.msra.gmra.mxu1 %vm702_vm2, %v695_v35  ;;  %3435 = vmatmul.mubr.msk.f32.vlgmr.msra.gmra.mxu0 %vm702_vm2, %v874_v36 }
 0x2bc   :  { %3424 = vmatpush3.msra.mxu1 %v4175_v27  ;;  %3427 = vmatprep.mubr.msk.f32.mxu1 %vm702_vm2, %v784_v37 }
 0x2bd   :  { %3425 = vmatprep.subr.mxu1 %v4177_v28  ;;  %3460 = vmatprep.mubr.msk.f32.mxu0 %vm1164_vm3, %v4257_v45 }
 0x2be   :  { %3426 = vmatpush3.msra.mxu1 %v4177_v28 }
 0x2bf   :  { %3437 = vmatprep.subr.mxu1 %v4180_v29  ;;  %3428 = vmatmul.mubr.msk.f32.vlgmr.msra.gmra.mxu1 %vm702_vm2, %v785_v38 }
 0x2c0   :  { %3438 = vmatpush3.msra.mxu1 %v4180_v29  ;;  %3441 = vmatprep.mubr.msk.f32.mxu1 %vm702_vm2, %v962_v39 }
 0x2c1   :  { %3439 = vmatprep.subr.mxu1 %v4182_v30 }
 0x2c2   :  { %3440 = vmatpush3.msra.mxu1 %v4182_v30 }
 0x2c3   :  { %3442 = vmatmul.mubr.msk.f32.vlgmr.msra.gmra.mxu1 %vm702_vm2, %v963_v40  ;;  %3463 = vmatprep.subr.mxu1 %v1249_v46  ;;  %v4312_v40 = vld [vmem:[#allocation7 + $0x10] sm:$0xff] }
 0x2c4   :  { %3464 = vmatpush3.msra.mxu1 %v1249_v46 }
 0x2c5   :  { %3465 = vmatprep.subr.mxu1 %v1248_v47 }
 0x2c6   :  { %3466 = vmatpush3.msra.mxu1 %v1248_v47 }
 0x37b   :  { %v4211_v27 = vpop.f32.mrf.mxu0  ;;  %v4215_v28 = vpop.f32.mrf.mxu1 }
 0x37c   :  { %1069 = vrot.lane.b32.xlu1 %v4211_v27, %s3944_s27 }
 0x37d   :  { %v4217_v41 = vpop.f32.mrf.mxu0  ;;  %v4223_v29 = vpop.f32.mrf.mxu1 }
 0x37e   :  { %1067 = vrot.lane.b32.xlu0 %v4217_v41, %s3944_s27 }
 0x37f   :  { %v4229_v30 = vpop.f32.mrf.mxu1 }
 0x380   :  { %1093 = vrot.lane.b32.xlu1 %v4211_v27, %s3945_s0 }
 0x381   :  { %v4235_v42 = vpop.f32.mrf.mxu1 }
 0x382   :  { %1091 = vrot.lane.b32.xlu0 %v4217_v41, %s3945_s0 }
 0x383   :  { %v3443_v43 = vpop.f32.mrf.mxu1 }
 0x384   :  { %1117 = vrot.lane.b32.xlu1 %v4211_v27, %s3965_s3 }
 0x385   :  { %v1042_v44 = vpop.f32.mrf.mxu1 }
 0x386   :  { %1115 = vrot.lane.b32.xlu0 %v4217_v41, %s3965_s3 }
 0x388   :  { %1065 = vrot.lane.b32.xlu1 %v4229_v30, %s3944_s27 }
 0x38a   :  { %1063 = vrot.lane.b32.xlu0 %v4235_v42, %s3944_s27 }
 0x38c   :  { %1089 = vrot.lane.b32.xlu1 %v4229_v30, %s3945_s0 }
 0x38e   :  { %1087 = vrot.lane.b32.xlu0 %v4235_v42, %s3945_s0 }
 0x390   :  { %1113 = vrot.lane.b32.xlu1 %v4229_v30, %s3965_s3 }
 0x392   :  { %1073 = vrot.lane.b32.xlu0 %v3443_v43, %s3944_s27 }
 0x394   :  { %1097 = vrot.lane.b32.xlu1 %v3443_v43, %s3945_s0 }
 0x396   :  { %1071 = vrot.lane.b32.xlu0 %v1042_v44, %s3944_s27 }
 0x398   :  { %1121 = vrot.lane.b32.xlu1 %v3443_v43, %s3965_s3 }
 0x39a   :  { %1095 = vrot.lane.b32.xlu0 %v1042_v44, %s3945_s0 }
 0x39c   :  { %1061 = vrot.lane.b32.xlu1 %v4215_v28, %s3944_s27 }
 0x39e   :  { %1119 = vrot.lane.b32.xlu0 %v1042_v44, %s3965_s3 }
 0x3a0   :  { %1085 = vrot.lane.b32.xlu1 %v4215_v28, %s3945_s0 }
 0x3a2   :  { %1111 = vrot.lane.b32.xlu0 %v4235_v42, %s3965_s3 }
 0x3a4   :  { %1109 = vrot.lane.b32.xlu1 %v4215_v28, %s3965_s3 }
 0x3a6   :  { %1059 = vrot.lane.b32.xlu0 %v4223_v29, %s3944_s27 }
 0x3a8   :  { %1107 = vrot.lane.b32.xlu1 %v4223_v29, %s3965_s3 }
 0x3aa   :  { %1083 = vrot.lane.b32.xlu0 %v4223_v29, %s3945_s0 }
 0x3ee   :  { %v1070_v48 = vpop.permute.xlu1 %1069 }
 0x3ef   :  { %v1136_v8 = vsel %vm289_vm1, %v4211_v27, %v1070_v48 }
 0x3f0   :  { %v1068_v49 = vpop.permute.xlu0 %1067 }
 0x3f1   :  { %v1135_v14 = vsel %vm289_vm1, %v4217_v41, %v1068_v49  ;;  %v4324_v49 = vld [vmem:[#allocation7] sm:$0xff] }
 0x3f2   :  { %v1094_v50 = vpop.permute.xlu1 %1093 }
 0x3f3   :  { %v1144_v11 = vsel %vm702_vm2, %v1136_v8, %v1094_v50 }
 0x3f4   :  { %v1092_v51 = vpop.permute.xlu0 %1091 }
 0x3f5   :  { %v1143_v18 = vsel %vm702_vm2, %v1135_v14, %v1092_v51 }
 0x3f6   :  { %v1118_v52 = vpop.permute.xlu1 %1117 }
 0x3f7   :  { %v1153_v16 = vsel %vm1147_vm4, %v1144_v11, %v1118_v52 }
 0x3f8   :  { %v1116_v53 = vpop.permute.xlu0 %1115  ;;  %v1161_v26 = vmul.f32 %v1153_v16, %v4290_v15 }
 0x3f9   :  { %v1152_v22 = vsel %vm1147_vm4, %v1143_v18, %v1116_v53  ;;  %v1400_v18 = vld [vmem:[%s4664_s10 + $0x8] sm:$0xff] }
 0x3fa   :  { %v1066_v54 = vpop.permute.xlu1 %1065  ;;  %v1160_v36 = vmul.f32 %v1152_v22, %v4296_v21  ;;  %v1499_v22 = vld [vmem:[%s4666_s12 + $0x30] sm:$0xff] }
 0x3fb   :  { %v1134_v23 = vsel %vm289_vm1, %v4229_v30, %v1066_v54  ;;  %v4329_v54 = vld [vmem:[#allocation5 + $0x8] sm:$0xff] }
 0x3fc   :  { %v1064_v55 = vpop.permute.xlu0 %1063 }
 0x3fd   :  { %v1133_v33 = vsel %vm289_vm1, %v4235_v42, %v1064_v55  ;;  %v1246_v55 = vld [vmem:[%s4660_s6] sm:$0xff] }
 0x3fe   :  { %v1090_v56 = vpop.permute.xlu1 %1089 }
 0x3ff   :  { %v1142_v31 = vsel %vm702_vm2, %v1134_v23, %v1090_v56  ;;  %v1498_v23 = vld [vmem:[%s4666_s12 + $0x28] sm:$0xff] }
 0x400   :  { %v1088_v57 = vpop.permute.xlu0 %1087 }
 0x401   :  { %v1141_v37 = vsel %vm702_vm2, %v1133_v33, %v1088_v57 }
 0x402   :  { %v1114_v58 = vpop.permute.xlu1 %1113 }
 0x403   :  { %v1151_v35 = vsel %vm1147_vm4, %v1142_v31, %v1114_v58  ;;  %v3160_v58 = vld [vmem:[#allocation8] ss:$0 sm:$0xff] }
 0x404   :  { %v1074_v59 = vpop.permute.xlu0 %1073  ;;  %v1159_v41 = vmul.f32 %v1151_v35, %v4305_v34 }
 0x405   :  { %v1138_v61 = vsel %vm289_vm1, %v3443_v43, %v1074_v59  ;;  %v4317_v43 = vld [vmem:[#allocation7 + $0x8] sm:$0xff] }
 0x406   :  { %v1098_v60 = vpop.permute.xlu1 %1097 }
 0x407   :  { %v1146_v0 = vsel %vm702_vm2, %v1138_v61, %v1098_v60 }
 0x408   :  { %v1072_v62 = vpop.permute.xlu0 %1071 }
 0x409   :  { %v1137_v9 = vsel %vm289_vm1, %v1042_v44, %v1072_v62 }
 0x40a   :  { %v1122_v1 = vpop.permute.xlu1 %1121 }
 0x40b   :  { %v1155_v3 = vsel %vm1147_vm4, %v1146_v0, %v1122_v1 }
 0x40c   :  { %v1163_v4 = vmul.f32 %v1155_v3, %v4276_v63  ;;  %v1096_v6 = vpop.permute.xlu0 %1095 }
 0x40d   :  { %v1145_v12 = vsel %vm702_vm2, %v1137_v9, %v1096_v6 }
 0x40e   :  { %v1062_v7 = vpop.permute.xlu1 %1061  ;;  %3444 = vmatprep.subr.mxu0 %v1163_v4 }
 0x40f   :  { %3445 = vmatpush3.msra.mxu0 %v1163_v4  ;;  %v1132_v39 = vsel %vm289_vm1, %v4215_v28, %v1062_v7 }
 0x410   :  { %v1120_v13 = vpop.permute.xlu0 %1119 }
 0x411   :  { %v1154_v17 = vsel %vm1147_vm4, %v1145_v12, %v1120_v13 }
 0x412   :  { %v1162_v19 = vmul.f32 %v1154_v17, %v4284_v10  ;;  %v1086_v20 = vpop.permute.xlu1 %1085  ;;  %v1401_v17 = vld [vmem:[%s4664_s10 + $0x10] sm:$0xff] }
 0x413   :  { %v1140_v30 = vsel %vm702_vm2, %v1132_v39, %v1086_v20  ;;  %v1500_v20 = vld [vmem:[%s4666_s12 + $0x38] sm:$0xff] }
 0x414   :  { %3446 = vmatprep.subr.mxu0 %v1162_v19  ;;  %v1112_v32 = vpop.permute.xlu0 %1111 }
 0x415   :  { %3447 = vmatpush3.msra.mxu0 %v1162_v19  ;;  %v1150_v27 = vsel %vm1147_vm4, %v1141_v37, %v1112_v32  ;;  %v1399_v19 = vld [vmem:[%s4664_s10] sm:$0xff] }
 0x416   :  { %v1110_v38 = vpop.permute.xlu1 %1109  ;;  %3448 = vmatprep.subr.mxu0 %v1161_v26  ;;  %v1158_v46 = vmul.f32 %v1150_v27, %v4312_v40 }
 0x417   :  { %3449 = vmatpush3.msra.mxu0 %v1161_v26  ;;  %v1149_v44 = vsel %vm1147_vm4, %v1140_v30, %v1110_v38  ;;  %v1497_v26 = vld [vmem:[%s4666_s12 + $0x20] sm:$0xff] }
 0x418   :  { %3450 = vmatprep.subr.mxu0 %v1160_v36  ;;  %v1060_v42 = vpop.permute.xlu0 %1059  ;;  %v1157_v28 = vmul.f32 %v1149_v44, %v4317_v43 }
 0x419   :  { %3451 = vmatpush3.msra.mxu0 %v1160_v36  ;;  %v1131_v47 = vsel %vm289_vm1, %v4223_v29, %v1060_v42  ;;  %v1247_v29 = vld [vmem:[%s4660_s6 + $0x8] sm:$0xff] }
 0x41a   :  { %3452 = vmatprep.subr.mxu0 %v1159_v41  ;;  %v1108_v50 = vpop.permute.xlu1 %1107  ;;  %3467 = vmatprep.subr.mxu1 %v1247_v29 }
 0x41b   :  { %3453 = vmatpush3.msra.mxu0 %v1159_v41  ;;  %3468 = vmatpush3.msra.mxu1 %v1247_v29 }
 0x41c   :  { %3454 = vmatprep.subr.mxu0 %v1158_v46  ;;  %v1084_v48 = vpop.permute.xlu0 %1083  ;;  %3469 = vmatprep.subr.mxu1 %v1246_v55 }
 0x41d   :  { %v1139_v51 = vsel %vm702_vm2, %v1131_v47, %v1084_v48  ;;  %3455 = vmatpush3.msra.mxu0 %v1158_v46  ;;  %3470 = vmatpush3.msra.mxu1 %v1246_v55  ;;  %v3163_v48 = vld [vmem:[#allocation10] ss:$0 sm:$0xff] }
 0x41e   :  { %v1148_v52 = vsel %vm1147_vm4, %v1139_v51, %v1108_v50  ;;  %3456 = vmatprep.subr.mxu0 %v1157_v28 }
 0x41f   :  { %3457 = vmatpush3.msra.mxu0 %v1157_v28  ;;  %v1156_v53 = vmul.f32 %v1148_v52, %v4324_v49  ;;  %v3164_v52 = vld [vmem:[#allocation11] ss:$0 sm:$0xff] }
 0x421   :  { %3458 = vmatprep.subr.mxu0 %v1156_v53 }
 0x422   :  { %3459 = vmatpush3.msra.mxu0 %v1156_v53 }
 0x423   :  { %3461 = vmatmul.mubr.msk.f32.vlgmr.msra.gmra.mxu0 %vm1164_vm3, %v4329_v54  ;;  %3485 = vmatprep.subr.mxu0 %v1500_v20 }
 0x424   :  { %3486 = vmatpush3.msra.mxu0 %v1500_v20 }
 0x425   :  { %3487 = vmatprep.subr.mxu0 %v1499_v22 }
 0x426   :  { %3488 = vmatpush3.msra.mxu0 %v1499_v22 }
 0x427   :  { %3489 = vmatprep.subr.mxu0 %v1498_v23 }
 0x428   :  { %3490 = vmatpush3.msra.mxu0 %v1498_v23 }
 0x429   :  { %3491 = vmatprep.subr.mxu0 %v1497_v26 }
 0x42a   :  { %3492 = vmatpush3.msra.mxu0 %v1497_v26 }
 0x4e3   :  { %v3462_v56 = vpop.f32.mrf.mxu0 }
 0x4e5   :  { %v1237_v57 = vpop.f32.mrf.mxu0 }
 0x4e6   :  { %3471 = vmatprep.mubr.msk.f32.mxu1 %vm201_vm0, %v1237_v57 }
 0x4e7   :  { %3472 = vmatmul.mubr.msk.f32.vlgmr.msra.gmra.mxu1 %vm201_vm0, %v3462_v56 }
 0x5a7   :  { %v3473_v59 = vpop.f32.mrf.mxu1 }
 0x5a8   :  { %v1335_v60 = vadd.f32 %v3473_v59, %v3160_v58  ;;  %v1496_v59 = vld [vmem:[%s4666_s12 + $0x18] sm:$0xff] }
 0x5a9   :  { %v1329_v61 = vpop.f32.mrf.mxu1  ;;  %3493 = vmatprep.subr.mxu0 %v1496_v59 }
 0x5aa   :  { %v1330_v62 = vadd.f32 %v3160_v58, %v1329_v61  ;;  %v1339_v0 = vadd.f32 %v1335_v60, %v4122_v5  ;;  %3494 = vmatpush3.msra.mxu0 %v1496_v59  ;;  %v1495_v60 = vld [vmem:[%s4666_s12 + $0x10] sm:$0xff]  ;;  %v1494_v61 = vld [vmem:[%s4666_s12 + $0x8] sm:$0xff] }
 0x5ab   :  { %3495 = vmatprep.subr.mxu0 %v1495_v60 }
 0x5ac   :  { %v1345_v1 = vsel %vm201_vm0, %v1339_v0, 0.0  ;;  %v1338_v3 = vadd.f32 %v1330_v62, %v4112_v2  ;;  %v1402_v2 = vld [vmem:[%s4664_s10 + $0x18] sm:$0xff]  ;;  %3496 = vmatpush3.msra.mxu0 %v1495_v60  ;;  %v1493_v62 = vld [vmem:[%s4666_s12] sm:$0xff] }
 0x5ad   :  { %1346 = vadd.xlane.f32.xlu1 %v1345_v1  ;;  %3474 = vmatprep.subr.mxu1 %v1402_v2 }
 0x5ae   :  { %v1342_v4 = vsel %vm201_vm0, %v1338_v3, 0.0  ;;  %3475 = vmatpush3.msra.mxu1 %v1402_v2  ;;  %3497 = vmatprep.subr.mxu0 %v1494_v61 }
 0x5af   :  { %1343 = vadd.xlane.f32.xlu0 %v1342_v4  ;;  %3476 = vmatprep.subr.mxu1 %v1401_v17 }
 0x5b0   :  { %3477 = vmatpush3.msra.mxu1 %v1401_v17  ;;  %3498 = vmatpush3.msra.mxu0 %v1494_v61 }
 0x5b1   :  { %3478 = vmatprep.subr.mxu1 %v1400_v18  ;;  %3499 = vmatprep.subr.mxu0 %v1493_v62 }
 0x5b2   :  { %3479 = vmatpush3.msra.mxu1 %v1400_v18  ;;  %3500 = vmatpush3.msra.mxu0 %v1493_v62 }
 0x5b3   :  { %3480 = vmatprep.subr.mxu1 %v1399_v19 }
 0x5b4   :  { %3481 = vmatpush3.msra.mxu1 %v1399_v19 }
 0x636   :  { %v1347_v6 = vpop.xlane.xlu1 %1346 }
 0x637   :  { %v1350_v7 = vmul.f32 0.03125, %v1347_v6 }
 0x638   :  { %v1344_v8 = vpop.xlane.xlu0 %1343 }
 0x639   :  { %v1349_v9 = vmul.f32 0.03125, %v1344_v8  ;;  %v1352_v11 = vsub.f32 %v1339_v0, %v1350_v7  ;;  %v3165_v0 = vld [vmem:[#allocation13] ss:$0 sm:$0xff] }
 0x63b   :  { %v1351_v12 = vsub.f32 %v1338_v3, %v1349_v9  ;;  %v1354_v16 = vmul.f32 %v1352_v11, %v1352_v11  ;;  %v1370_v55 = vmul.f32 %v3163_v48, %v1352_v11  ;;  %v3168_v9 = vld [vmem:[#allocation14] ss:$0 sm:$0xff] }
 0x63d   :  { %v1353_v13 = vmul.f32 %v1351_v12, %v1351_v12  ;;  %v1358_v5 = vsel %vm201_vm0, %v1354_v16, 0.0  ;;  %v1369_v50 = vmul.f32 %v3163_v48, %v1351_v12 }
 0x63f   :  { %v1355_v14 = vsel %vm201_vm0, %v1353_v13, 0.0 }
 0x640   :  { %1356 = vadd.xlane.f32.xlu0 %v1355_v14 }
 0x644   :  { %1359 = vadd.xlane.f32.xlu0 %v1358_v5 }
 0x6c9   :  { %v1357_v31 = vpop.xlane.xlu0 %1356 }
 0x6ca   :  { %v1361_v32 = vmul.f32 0.03125, %v1357_v31 }
 0x6cc   :  { %v1371_v33 = vadd.f32 1e-05, %v1361_v32 }
 0x6cd   :  { %v1360_v35 = vpop.xlane.xlu0 %1359 }
 0x6ce   :  { %3677 = vrsqrt.f32 %v1371_v33  ;;  %v1362_v36 = vmul.f32 0.03125, %v1360_v35  ;;  %vm1375_vm5 = vcmp.eq.f32.partialorder %v1371_v33, inf  ;;  %v1378_v27 = vand.u32 2147483648, %v1371_v33 }
 0x6cf   :  { %vm1377_vm6 = vcmp.eq.f32.partialorder %v1371_v33, 0.0 }
 0x6d0   :  { %v1372_v37 = vadd.f32 1e-05, %v1362_v36  ;;  %v3176_v36 = vld [vmem:[%s4658_s4 + $0x38] sm:$0xff] }
 0x6d1   :  { %3504 = vmatprep.subr.mxu1 %v3176_v36 }
 0x6d2   :  { %3679 = vrsqrt.f32 %v1372_v37  ;;  %vm1382_vm7 = vcmp.eq.f32.partialorder %v1372_v37, inf  ;;  %v1385_v46 = vand.u32 2147483648, %v1372_v37  ;;  %vm1384_vm8 = vcmp.eq.f32.partialorder %v1372_v37, 0.0 }
 0x6db   :  { %v3678_v38 = vpop.eup %3677 }
 0x6dc   :  { %v1374_v39 = vmul.f32 %v3678_v38, %v1371_v33  ;;  %v3174_v38 = vld [vmem:[%s4658_s4 + $0x28] sm:$0xff] }
 0x6de   :  { %v1376_v41 = vsel %vm1375_vm5, %v1371_v33, %v1374_v39  ;;  %v3173_v39 = vld [vmem:[%s4658_s4 + $0x20] sm:$0xff] }
 0x6df   :  { %v1379_v30 = vsel %vm1377_vm6, %v1378_v27, %v1376_v41  ;;  %v3680_v42 = vpop.eup %3679 }
 0x6e0   :  { %3681 = vrcp.f32 %v1379_v30  ;;  %v1381_v44 = vmul.f32 %v3680_v42, %v1372_v37 }
 0x6e2   :  { %v1383_v28 = vsel %vm1382_vm7, %v1372_v37, %v1381_v44  ;;  %v3175_v37 = vld [vmem:[%s4658_s4 + $0x30] sm:$0xff] }
 0x6e3   :  { %v1386_v47 = vsel %vm1384_vm8, %v1385_v46, %v1383_v28 }
 0x6e4   :  { %3683 = vrcp.f32 %v1386_v47 }
 0x6ed   :  { %v3682_v51 = vpop.eup %3681 }
 0x6ee   :  { %v1388_v53 = vmul.f32 %v3682_v51, %v1369_v50 }
 0x6f0   :  { %v1397_v29 = vadd.f32 %v3164_v52, %v1388_v53 }
 0x6f1   :  { %v3684_v56 = vpop.eup %3683 }
 0x6f2   :  { %3482 = vmatprep.mubr.msk.f32.mxu1 %vm201_vm0, %v1397_v29  ;;  %v1390_v57 = vmul.f32 %v3684_v56, %v1370_v55 }
 0x6f4   :  { %v1398_v58 = vadd.f32 %v3164_v52, %v1390_v57  ;;  %v3171_v57 = vld [vmem:[%s4668_s14] ss:$0 sm:$0xff] }
 0x6f6   :  { %3483 = vmatmul.mubr.msk.f32.vlgmr.msra.gmra.mxu1 %vm201_vm0, %v1398_v58 }
 0x6f7   :  { %3505 = vmatpush3.msra.mxu1 %v3176_v36 }
 0x6f8   :  { %3506 = vmatprep.subr.mxu1 %v3175_v37 }
 0x6f9   :  { %3507 = vmatpush3.msra.mxu1 %v3175_v37 }
 0x6fa   :  { %3508 = vmatprep.subr.mxu1 %v3174_v38 }
 0x6fb   :  { %3509 = vmatpush3.msra.mxu1 %v3174_v38 }
 0x6fc   :  { %3510 = vmatprep.subr.mxu1 %v3173_v39 }
 0x6fd   :  { %3511 = vmatpush3.msra.mxu1 %v3173_v39 }
 0x7b6   :  { %v3484_v1 = vpop.f32.mrf.mxu1 }
 0x7b7   :  { %v1488_v3 = vadd.f32 %v3484_v1, %v3165_v0 }
 0x7b8   :  { %v1482_v4 = vpop.f32.mrf.mxu1 }
 0x7b9   :  { %v1483_v6 = vadd.f32 %v3165_v0, %v1482_v4  ;;  %v1492_v8 = vmax.f32 %v1488_v3, 0.0  ;;  %v3172_v0 = vld [vmem:[#allocation16] ss:$0 sm:$0xff] }
 0x7bb   :  { %v1491_v7 = vmax.f32 %v1483_v6, 0.0  ;;  %v3178_v6 = vld [vmem:[%s4659_s5 + $0x1] ss:$0 sm:$0xff] }
 0x7bd   :  { %3501 = vmatprep.mubr.msk.f32.mxu0 %vm1164_vm3, %v1491_v7 }
 0x7be   :  { %3502 = vmatmul.mubr.msk.f32.vlgmr.msra.gmra.mxu0 %vm1164_vm3, %v1492_v8 }
 0x87e   :  { %v3503_v11 = vpop.f32.mrf.mxu0 }
 0x87f   :  { %v1586_v12 = vadd.f32 %v3503_v11, %v3168_v9 }
 0x880   :  { %v1580_v13 = vpop.f32.mrf.mxu0 }
 0x881   :  { %v1581_v14 = vadd.f32 %v3168_v9, %v1580_v13  ;;  %v1590_v16 = vadd.f32 %v1586_v12, %v1398_v58 }
 0x883   :  { %v1596_v5 = vsel %vm201_vm0, %v1590_v16, 0.0  ;;  %v1589_v2 = vadd.f32 %v1581_v14, %v1397_v29 }
 0x884   :  { %1597 = vadd.xlane.f32.xlu0 %v1596_v5 }
 0x885   :  { %v1593_v17 = vsel %vm201_vm0, %v1589_v2, 0.0 }
 0x886   :  { %1594 = vadd.xlane.f32.xlu1 %v1593_v17 }
 0x90d   :  { %v1598_v18 = vpop.xlane.xlu0 %1597 }
 0x90e   :  { %v1600_v19 = vmul.f32 0.03125, %v1598_v18 }
 0x90f   :  { %v1595_v20 = vpop.xlane.xlu1 %1594 }
 0x910   :  { %v1602_v22 = vsub.f32 %v1590_v16, %v1600_v19  ;;  %v1599_v23 = vmul.f32 0.03125, %v1595_v20 }
 0x912   :  { %v1601_v26 = vsub.f32 %v1589_v2, %v1599_v23  ;;  %v1604_v31 = vmul.f32 %v1602_v22, %v1602_v22  ;;  %v1620_v59 = vmul.f32 %v3171_v57, %v1602_v22 }
 0x914   :  { %v1608_v32 = vsel %vm201_vm0, %v1604_v31, 0.0  ;;  %v1603_v33 = vmul.f32 %v1601_v26, %v1601_v26  ;;  %v1619_v60 = vmul.f32 %v3171_v57, %v1601_v26 }
 0x915   :  { %1609 = vadd.xlane.f32.xlu0 %v1608_v32 }
 0x916   :  { %v1605_v35 = vsel %vm201_vm0, %v1603_v33, 0.0 }
 0x917   :  { %1606 = vadd.xlane.f32.xlu1 %v1605_v35 }
 0x99e   :  { %v1610_v27 = vpop.xlane.xlu0 %1609 }
 0x99f   :  { %v1612_v41 = vmul.f32 0.03125, %v1610_v27 }
 0x9a0   :  { %v1607_v30 = vpop.xlane.xlu1 %1606 }
 0x9a1   :  { %v1622_v42 = vadd.f32 1e-05, %v1612_v41  ;;  %v1611_v44 = vmul.f32 0.03125, %v1607_v30 }
 0x9a3   :  { %3685 = vrsqrt.f32 %v1622_v42  ;;  %v1621_v46 = vadd.f32 1e-05, %v1611_v44  ;;  %vm1632_vm9 = vcmp.eq.f32.partialorder %v1622_v42, inf  ;;  %v1635_v48 = vand.u32 2147483648, %v1622_v42 }
 0x9a4   :  { %vm1634_vm10 = vcmp.eq.f32.partialorder %v1622_v42, 0.0 }
 0x9a5   :  { %3687 = vrsqrt.f32 %v1621_v46  ;;  %vm1625_vm11 = vcmp.eq.f32.partialorder %v1621_v46, inf  ;;  %v1628_v29 = vand.u32 2147483648, %v1621_v46  ;;  %vm1627_vm12 = vcmp.eq.f32.partialorder %v1621_v46, 0.0 }
 0x9b0   :  { %v3686_v28 = vpop.eup %3685 }
 0x9b1   :  { %v1631_v47 = vmul.f32 %v3686_v28, %v1622_v42 }
 0x9b2   :  { %v3688_v50 = vpop.eup %3687 }
 0x9b3   :  { %v1633_v51 = vsel %vm1632_vm9, %v1622_v42, %v1631_v47  ;;  %v1624_v53 = vmul.f32 %v3688_v50, %v1621_v46 }
 0x9b4   :  { %v1636_v52 = vsel %vm1634_vm10, %v1635_v48, %v1633_v51 }
 0x9b5   :  { %3689 = vrcp.f32 %v1636_v52  ;;  %v1626_v55 = vsel %vm1625_vm11, %v1621_v46, %v1624_v53 }
 0x9b6   :  { %v1629_v56 = vsel %vm1627_vm12, %v1628_v29, %v1626_v55 }
 0x9b7   :  { %3691 = vrcp.f32 %v1629_v56 }
 0x9c2   :  { %v3690_v58 = vpop.eup %3689 }
 0x9c3   :  { %v1640_v62 = vmul.f32 %v3690_v58, %v1620_v59 }
 0x9c4   :  { %v3692_v61 = vpop.eup %3691 }
 0x9c5   :  { %v1638_v1 = vmul.f32 %v3692_v61, %v1619_v60  ;;  %v4408_v4 = vadd.f32 %v3172_v0, %v1640_v62 }
 0x9c7   :  { %v4406_v3 = vadd.f32 %v3172_v0, %v1638_v1 }
 0x9c9   :  { %3512 = vmatprep.mubr.msk.f32.mxu1 %vm201_vm0, %v4406_v3 }
 0x9ca   :  { %3513 = vmatmul.mubr.msk.f32.vlgmr.msra.gmra.mxu1 %vm201_vm0, %v4408_v4 }
 0xa8a   :  { %v3514_v7 = vpop.f32.mrf.mxu1 }
 0xa8b   :  { %v1740_v8 = vadd.f32 %v3514_v7, %v3178_v6 }
 0xa8c   :  { %v1734_v9 = vpop.f32.mrf.mxu1 }
 0xa8d   :  { %v1735_v11 = vadd.f32 %v3178_v6, %v1734_v9  ;;  %1840 = vrot.lane.b32.xlu0 %v1740_v8, %s3957_s20  ;;  %1747 = vrot.lane.b32.xlu1 %v1740_v8, %s3955_s19 }
 0xa8f   :  { %3519 = vmatprep.mubr.msk.f32.mxu1 %vm289_vm1, %v1735_v11 }
 0xa91   :  { %1933 = vrot.lane.b32.xlu0 %v1740_v8, %s3958_s9  ;;  %1836 = vrot.lane.b32.xlu1 %v1740_v8, %s3954_s18 }
 0xa95   :  { %2026 = vrot.lane.b32.xlu0 %v1740_v8, %s3959_s21  ;;  %1929 = vrot.lane.b32.xlu1 %v1740_v8, %s3956_s2 }
 0xa99   :  { %1931 = vrot.lane.b32.xlu0 %v1735_v11, %s3958_s9  ;;  %1745 = vrot.lane.b32.xlu1 %v1735_v11, %s3955_s19 }
 0xa9d   :  { %1927 = vrot.lane.b32.xlu0 %v1735_v11, %s3956_s2  ;;  %1838 = vrot.lane.b32.xlu1 %v1735_v11, %s3957_s20 }
 0xaa1   :  { %2020 = vrot.lane.b32.xlu0 %v1735_v11, %s3960_s23  ;;  %1834 = vrot.lane.b32.xlu1 %v1735_v11, %s3954_s18 }
 0xaa5   :  { %2157 = vrot.lane.b32.xlu0 %v1740_v8, %s3961_s22  ;;  %2024 = vrot.lane.b32.xlu1 %v1735_v11, %s3959_s21  ;;  %s3966_s21 = smov [#allocation17]  }
 0xaa9   :  { %2246 = vrot.lane.b32.xlu0 %v1740_v8, %s3962_s8  ;;  %2022 = vrot.lane.b32.xlu1 %v1740_v8, %s3960_s23 }
 0xaad   :  { %2424 = vrot.lane.b32.xlu0 %v1740_v8, %s3963_s13  ;;  %2155 = vrot.lane.b32.xlu1 %v1735_v11, %s3961_s22 }
 0xab1   :  { %2335 = vrot.lane.b32.xlu0 %v1740_v8, %s3964_s11  ;;  %2244 = vrot.lane.b32.xlu1 %v1735_v11, %s3962_s8 }
 0xab5   :  { %2422 = vrot.lane.b32.xlu1 %v1735_v11, %s3963_s13 }
 0xab9   :  { %2333 = vrot.lane.b32.xlu1 %v1735_v11, %s3964_s11 }
 0xaff   :  { %v1841_v12 = vpop.permute.xlu0 %1840  ;;  %v1748_v13 = vpop.permute.xlu1 %1747 }
 0xb00   :  { %3515 = vmatprep.subr.msk.mxu1 %vm289_vm1, %v1748_v13  ;;  %3522 = vmatprep.subr.msk.mxu0 %vm289_vm1, %v1841_v12 }
 0xb01   :  { %3516 = vmatpush3.xpose.msk.msra.mxu1 %vm289_vm1, %v1748_v13  ;;  %3523 = vmatpush3.xpose.msk.msra.mxu0 %vm289_vm1, %v1841_v12 }
 0xb03   :  { %v1934_v14 = vpop.permute.xlu0 %1933  ;;  %v1837_v16 = vpop.permute.xlu1 %1836 }
 0xb07   :  { %v2027_v5 = vpop.permute.xlu0 %2026  ;;  %v1930_v2 = vpop.permute.xlu1 %1929 }
 0xb0b   :  { %v1932_v17 = vpop.permute.xlu0 %1931  ;;  %v1746_v18 = vpop.permute.xlu1 %1745 }
 0xb0c   :  { %3517 = vmatprep.subr.msk.mxu1 %vm289_vm1, %v1746_v18 }
 0xb0d   :  { %3518 = vmatpush3.xpose.msk.msra.mxu1 %vm289_vm1, %v1746_v18 }
 0xb0e   :  { %3529 = vmatprep.subr.msk.mxu1 %vm289_vm1, %v1934_v14 }
 0xb0f   :  { %v1928_v19 = vpop.permute.xlu0 %1927  ;;  %v1839_v20 = vpop.permute.xlu1 %1838 }
 0xb10   :  { %3520 = vmatmul.mubr.msk.f32.vlgmr.msra.gmra.mxu1 %vm289_vm1, %v1740_v8  ;;  %3524 = vmatprep.subr.msk.mxu0 %vm289_vm1, %v1839_v20 }
 0xb11   :  { %3525 = vmatpush3.xpose.msk.msra.mxu0 %vm289_vm1, %v1839_v20  ;;  %3530 = vmatpush3.xpose.msk.msra.mxu1 %vm289_vm1, %v1934_v14 }
 0xb12   :  { %3533 = vmatprep.mubr.msk.f32.mxu1 %vm289_vm1, %v1928_v19  ;;  %3531 = vmatprep.subr.msk.mxu1 %vm289_vm1, %v1932_v17 }
 0xb13   :  { %3536 = vmatprep.subr.msk.mxu0 %vm289_vm1, %v2027_v5  ;;  %v2021_v22 = vpop.permute.xlu0 %2020  ;;  %v1835_v23 = vpop.permute.xlu1 %1834 }
 0xb14   :  { %3526 = vmatprep.mubr.msk.f32.mxu0 %vm289_vm1, %v1835_v23 }
 0xb15   :  { %3527 = vmatmul.mubr.msk.f32.vlgmr.msra.gmra.mxu0 %vm289_vm1, %v1837_v16  ;;  %3532 = vmatpush3.xpose.msk.msra.mxu1 %vm289_vm1, %v1932_v17 }
 0xb16   :  { %3537 = vmatpush3.xpose.msk.msra.mxu0 %vm289_vm1, %v2027_v5  ;;  %3540 = vmatprep.mubr.msk.f32.mxu0 %vm289_vm1, %v2021_v22 }
 0xb17   :  { %v2158_v26 = vpop.permute.xlu0 %2157  ;;  %v2025_v31 = vpop.permute.xlu1 %2024 }
 0xb18   :  { %3534 = vmatmul.mubr.msk.f32.vlgmr.msra.gmra.mxu1 %vm289_vm1, %v1930_v2  ;;  %3538 = vmatprep.subr.msk.mxu0 %vm289_vm1, %v2025_v31 }
 0xb19   :  { %3543 = vmatprep.subr.mxu1 %v2158_v26 }
 0xb1a   :  { %3539 = vmatpush3.xpose.msk.msra.mxu0 %vm289_vm1, %v2025_v31  ;;  %3544 = vmatpush3.msra.mxu1 %v2158_v26 }
 0xb1b   :  { %v4462_v32 = vpop.permute.xlu0 %2246  ;;  %v2023_v33 = vpop.permute.xlu1 %2022 }
 0xb1d   :  { %3541 = vmatmul.mubr.msk.f32.vlgmr.msra.gmra.mxu0 %vm289_vm1, %v2023_v33 }
 0xb1f   :  { %v4465_v35 = vpop.permute.xlu0 %2424  ;;  %v2156_v36 = vpop.permute.xlu1 %2155 }
 0xb20   :  { %3545 = vmatprep.subr.mxu1 %v2156_v36 }
 0xb21   :  { %3546 = vmatpush3.msra.mxu1 %v2156_v36 }
 0xb22   :  { %3550 = vmatprep.subr.mxu1 %v4462_v32 }
 0xb23   :  { %v2336_v37 = vpop.permute.xlu0 %2335  ;;  %v4468_v38 = vpop.permute.xlu1 %2244 }
 0xb24   :  { %3557 = vmatprep.subr.mxu0 %v2336_v37 }
 0xb25   :  { %3558 = vmatpush3.msra.mxu0 %v2336_v37 }
 0xb27   :  { %v4470_v39 = vpop.permute.xlu1 %2422 }
 0xb2b   :  { %v2334_v27 = vpop.permute.xlu1 %2333 }
 0xb2c   :  { %3559 = vmatprep.subr.mxu0 %v2334_v27 }
 0xb2d   :  { %3560 = vmatpush3.msra.mxu0 %v2334_v27 }
 0xbd0   :  { %v3521_v41 = vpop.f32.mrf.mxu1 }
 0xbd1   :  { %v1833_v28 = vmul.f32 0.35355338, %v3521_v41 }
 0xbd2   :  { %v1823_v42 = vpop.f32.mrf.mxu1 }
 0xbd3   :  { %v1832_v53 = vmul.f32 0.35355338, %v1823_v42 }
 0xbd5   :  { %v3528_v30 = vpop.f32.mrf.mxu0 }
 0xbd6   :  { %v1926_v44 = vmul.f32 0.35355338, %v3528_v30 }
 0xbd7   :  { %v1916_v46 = vpop.f32.mrf.mxu0 }
 0xbd8   :  { %v3535_v47 = vpop.f32.mrf.mxu1  ;;  %v1925_v48 = vmul.f32 0.35355338, %v1916_v46  ;;  %v2114_v50 = vmax.f32 %v1833_v28, %v1926_v44 }
 0xbd9   :  { %v2019_v51 = vmul.f32 0.35355338, %v3535_v47 }
 0xbda   :  { %v2009_v52 = vpop.f32.mrf.mxu1  ;;  %v2113_v29 = vmax.f32 %v1832_v53, %v1925_v48 }
 0xbdb   :  { %v2018_v55 = vmul.f32 0.35355338, %v2009_v52  ;;  %v2116_v57 = vmax.f32 %v2114_v50, %v2019_v51 }
 0xbdd   :  { %v3542_v56 = vpop.f32.mrf.mxu0  ;;  %v2115_v62 = vmax.f32 %v2113_v29, %v2018_v55 }
 0xbde   :  { %v2112_v58 = vmul.f32 0.35355338, %v3542_v56 }
 0xbdf   :  { %v2102_v59 = vpop.f32.mrf.mxu0 }
 0xbe0   :  { %v2118_v60 = vmax.f32 %v2116_v57, %v2112_v58  ;;  %v2111_v61 = vmul.f32 0.35355338, %v2102_v59 }
 0xbe2   :  { %v2120_v0 = vsub.f32 %v1833_v28, %v2118_v60  ;;  %v2126_v1 = vsub.f32 %v1926_v44, %v2118_v60  ;;  %v2132_v6 = vsub.f32 %v2019_v51, %v2118_v60  ;;  %v2138_v7 = vsub.f32 %v2112_v58, %v2118_v60 }
 0xbe3   :  { %v2117_v8 = vmax.f32 %v2115_v62, %v2111_v61  ;;  %v3209_v62 = vld [vmem:[%s4660_s6 + $0x30] sm:$0xff] }
 0xbe4   :  { %v2123_v9 = vmul.f32 1.442695, %v2120_v0  ;;  %v2129_v11 = vmul.f32 1.442695, %v2126_v1  ;;  %v2135_v12 = vmul.f32 1.442695, %v2132_v6 }
 0xbe5   :  { %v2141_v13 = vmul.f32 1.442695, %v2138_v7  ;;  %v2119_v14 = vsub.f32 %v1832_v53, %v2117_v8  ;;  %v2125_v16 = vsub.f32 %v1925_v48, %v2117_v8  ;;  %v2131_v5 = vsub.f32 %v2018_v55, %v2117_v8 }
 0xbe6   :  { %3693 = vpow2.f32 %v2123_v9  ;;  %v2137_v18 = vsub.f32 %v2111_v61, %v2117_v8  ;;  %v3210_v61 = vld [vmem:[%s4660_s6 + $0x38] sm:$0xff] }
 0xbe7   :  { %3695 = vpow2.f32 %v2129_v11  ;;  %v2121_v2 = vmul.f32 1.442695, %v2119_v14  ;;  %v2127_v17 = vmul.f32 1.442695, %v2125_v16  ;;  %v2133_v19 = vmul.f32 1.442695, %v2131_v5 }
 0xbe8   :  { %3697 = vpow2.f32 %v2135_v12  ;;  %v2139_v20 = vmul.f32 1.442695, %v2137_v18 }
 0xbe9   :  { %3699 = vpow2.f32 %v2141_v13 }
 0xbea   :  { %3701 = vpow2.f32 %v2121_v2 }
 0xbeb   :  { %3703 = vpow2.f32 %v2127_v17 }
 0xbec   :  { %3705 = vpow2.f32 %v2133_v19 }
 0xbed   :  { %3707 = vpow2.f32 %v2139_v20 }
 0xbf3   :  { %v3694_v22 = vpop.eup %3693 }
 0xbf4   :  { %v3696_v23 = vpop.eup %3695 }
 0xbf5   :  { %v3698_v26 = vpop.eup %3697  ;;  %v2144_v31 = vadd.f32 %v3696_v23, %v3694_v22 }
 0xbf6   :  { %v3700_v33 = vpop.eup %3699 }
 0xbf7   :  { %v3702_v36 = vpop.eup %3701  ;;  %v2146_v37 = vadd.f32 %v3698_v26, %v2144_v31 }
 0xbf8   :  { %v3704_v27 = vpop.eup %3703 }
 0xbf9   :  { %v2148_v41 = vadd.f32 %v3700_v33, %v2146_v37  ;;  %v2143_v30 = vadd.f32 %v3704_v27, %v3702_v36  ;;  %v3706_v42 = vpop.eup %3705 }
 0xbfa   :  { %v3708_v46 = vpop.eup %3707 }
 0xbfb   :  { %v2145_v44 = vadd.f32 %v3706_v42, %v2143_v30  ;;  %3709 = vrcp.f32 %v2148_v41 }
 0xbfd   :  { %v2147_v28 = vadd.f32 %v3708_v46, %v2145_v44 }
 0xbff   :  { %3711 = vrcp.f32 %v2147_v28 }
 0xc08   :  { %v3710_v47 = vpop.eup %3709 }
 0xc09   :  { %v2152_v50 = vmul.f32 %v3710_v47, %v4187_v24 }
 0xc0b   :  { %v2154_v29 = vmul.f32 %v3694_v22, %v2152_v50  ;;  %v2332_v55 = vmul.f32 %v3698_v26, %v2152_v50  ;;  %v2243_v24 = vmul.f32 %v3696_v23, %v2152_v50 }
 0xc0c   :  { %v3712_v48 = vpop.eup %3711 }
 0xc0d   :  { %v2151_v51 = vmul.f32 %v3712_v48, %v4192_v25 }
 0xc0f   :  { %v2153_v52 = vmul.f32 %v3702_v36, %v2151_v51  ;;  %v2331_v53 = vmul.f32 %v3706_v42, %v2151_v51  ;;  %v2242_v56 = vmul.f32 %v3704_v27, %v2151_v51  ;;  %v2420_v25 = vmul.f32 %v3708_v46, %v2151_v51 }
 0xc11   :  { %3547 = vmatprep.mubr.msk.f32.mxu1 %vm702_vm2, %v2153_v52  ;;  %3561 = vmatprep.mubr.msk.f32.mxu0 %vm702_vm2, %v2331_v53 }
 0xc12   :  { %3548 = vmatmul.mubr.msk.f32.vlgmr.msra.gmra.mxu1 %vm702_vm2, %v2154_v29  ;;  %3562 = vmatmul.mubr.msk.f32.vlgmr.msra.gmra.mxu0 %vm702_vm2, %v2332_v55 }
 0xc13   :  { %3551 = vmatpush3.msra.mxu1 %v4462_v32  ;;  %3554 = vmatprep.mubr.msk.f32.mxu1 %vm702_vm2, %v2242_v56  ;;  %v2421_v32 = vmul.f32 %v3700_v33, %v2152_v50 }
 0xc14   :  { %3552 = vmatprep.subr.mxu1 %v4468_v38  ;;  %3587 = vmatprep.mubr.msk.f32.mxu0 %vm1164_vm3, %v4257_v45 }
 0xc15   :  { %3553 = vmatpush3.msra.mxu1 %v4468_v38 }
 0xc16   :  { %3564 = vmatprep.subr.mxu1 %v4465_v35  ;;  %3555 = vmatmul.mubr.msk.f32.vlgmr.msra.gmra.mxu1 %vm702_vm2, %v2243_v24 }
 0xc17   :  { %3565 = vmatpush3.msra.mxu1 %v4465_v35  ;;  %3568 = vmatprep.mubr.msk.f32.mxu1 %vm702_vm2, %v2420_v25 }
 0xc18   :  { %3566 = vmatprep.subr.mxu1 %v4470_v39 }
 0xc19   :  { %3567 = vmatpush3.msra.mxu1 %v4470_v39 }
 0xc1a   :  { %3569 = vmatmul.mubr.msk.f32.vlgmr.msra.gmra.mxu1 %vm702_vm2, %v2421_v32  ;;  %3590 = vmatprep.subr.mxu1 %v3210_v61 }
 0xc1b   :  { %3591 = vmatpush3.msra.mxu1 %v3210_v61 }
 0xc1c   :  { %3592 = vmatprep.subr.mxu1 %v3209_v62 }
 0xc1d   :  { %3593 = vmatpush3.msra.mxu1 %v3209_v62 }
 0xcd2   :  { %v3563_v57 = vpop.f32.mrf.mxu0  ;;  %v4492_v45 = vpop.f32.mrf.mxu1 }
 0xcd3   :  { %2527 = vrot.lane.b32.xlu1 %v3563_v57, %s3944_s27 }
 0xcd4   :  { %v4494_v38 = vpop.f32.mrf.mxu0  ;;  %v4499_v35 = vpop.f32.mrf.mxu1 }
 0xcd5   :  { %2525 = vrot.lane.b32.xlu0 %v4494_v38, %s3944_s27 }
 0xcd6   :  { %v4504_v39 = vpop.f32.mrf.mxu1 }
 0xcd7   :  { %2551 = vrot.lane.b32.xlu1 %v3563_v57, %s3945_s0 }
 0xcd8   :  { %v4510_v58 = vpop.f32.mrf.mxu1 }
 0xcd9   :  { %2549 = vrot.lane.b32.xlu0 %v4494_v38, %s3945_s0 }
 0xcda   :  { %v3570_v59 = vpop.f32.mrf.mxu1 }
 0xcdb   :  { %2575 = vrot.lane.b32.xlu1 %v3563_v57, %s3965_s3 }
 0xcdc   :  { %v2500_v60 = vpop.f32.mrf.mxu1 }
 0xcdd   :  { %2573 = vrot.lane.b32.xlu0 %v4494_v38, %s3965_s3 }
 0xcdf   :  { %2523 = vrot.lane.b32.xlu1 %v4504_v39, %s3944_s27 }
 0xce1   :  { %2521 = vrot.lane.b32.xlu0 %v4510_v58, %s3944_s27 }
 0xce3   :  { %2547 = vrot.lane.b32.xlu1 %v4504_v39, %s3945_s0 }
 0xce5   :  { %2545 = vrot.lane.b32.xlu0 %v4510_v58, %s3945_s0 }
 0xce7   :  { %2571 = vrot.lane.b32.xlu1 %v4504_v39, %s3965_s3 }
 0xce9   :  { %2531 = vrot.lane.b32.xlu0 %v3570_v59, %s3944_s27 }
 0xceb   :  { %2555 = vrot.lane.b32.xlu1 %v3570_v59, %s3945_s0 }
 0xced   :  { %2529 = vrot.lane.b32.xlu0 %v2500_v60, %s3944_s27 }
 0xcef   :  { %2579 = vrot.lane.b32.xlu1 %v3570_v59, %s3965_s3 }
 0xcf1   :  { %2553 = vrot.lane.b32.xlu0 %v2500_v60, %s3945_s0 }
 0xcf3   :  { %2519 = vrot.lane.b32.xlu1 %v4492_v45, %s3944_s27 }
 0xcf5   :  { %2577 = vrot.lane.b32.xlu0 %v2500_v60, %s3965_s3 }
 0xcf7   :  { %2543 = vrot.lane.b32.xlu1 %v4492_v45, %s3945_s0 }
 0xcf9   :  { %2569 = vrot.lane.b32.xlu0 %v4510_v58, %s3965_s3 }
 0xcfb   :  { %2567 = vrot.lane.b32.xlu1 %v4492_v45, %s3965_s3 }
 0xcfd   :  { %2517 = vrot.lane.b32.xlu0 %v4499_v35, %s3944_s27 }
 0xcff   :  { %2565 = vrot.lane.b32.xlu1 %v4499_v35, %s3965_s3 }
 0xd01   :  { %2541 = vrot.lane.b32.xlu0 %v4499_v35, %s3945_s0 }
 0xd45   :  { %v2528_v0 = vpop.permute.xlu1 %2527 }
 0xd46   :  { %v2594_v33 = vsel %vm289_vm1, %v3563_v57, %v2528_v0 }
 0xd47   :  { %v2526_v1 = vpop.permute.xlu0 %2525 }
 0xd48   :  { %v2593_v30 = vsel %vm289_vm1, %v4494_v38, %v2526_v1 }
 0xd49   :  { %v2552_v6 = vpop.permute.xlu1 %2551 }
 0xd4a   :  { %v2602_v37 = vsel %vm702_vm2, %v2594_v33, %v2552_v6  ;;  %v3228_v33 = vld [vmem:[%s4666_s12 + $0x68] sm:$0xff] }
 0xd4b   :  { %v2550_v7 = vpop.permute.xlu0 %2549 }
 0xd4c   :  { %v2601_v44 = vsel %vm702_vm2, %v2593_v30, %v2550_v7 }
 0xd4d   :  { %v2576_v8 = vpop.permute.xlu1 %2575 }
 0xd4e   :  { %v2610_v42 = vsel %vm1147_vm4, %v2602_v37, %v2576_v8 }
 0xd4f   :  { %v2574_v9 = vpop.permute.xlu0 %2573  ;;  %v2618_v50 = vmul.f32 %v2610_v42, %v4290_v15 }
 0xd50   :  { %v2609_v47 = vsel %vm1147_vm4, %v2601_v44, %v2574_v9 }
 0xd51   :  { %v2524_v11 = vpop.permute.xlu1 %2523 }
 0xd52   :  { %v2592_v48 = vsel %vm289_vm1, %v4504_v39, %v2524_v11 }
 0xd53   :  { %v2522_v12 = vpop.permute.xlu0 %2521 }
 0xd54   :  { %v2591_v53 = vsel %vm289_vm1, %v4510_v58, %v2522_v12 }
 0xd55   :  { %v2548_v13 = vpop.permute.xlu1 %2547 }
 0xd56   :  { %v2600_v51 = vsel %vm702_vm2, %v2592_v48, %v2548_v13 }
 0xd57   :  { %v2546_v14 = vpop.permute.xlu0 %2545 }
 0xd58   :  { %v2599_v55 = vsel %vm702_vm2, %v2591_v53, %v2546_v14 }
 0xd59   :  { %v2572_v16 = vpop.permute.xlu1 %2571 }
 0xd5a   :  { %v2608_v29 = vsel %vm1147_vm4, %v2600_v51, %v2572_v16 }
 0xd5b   :  { %v2532_v5 = vpop.permute.xlu0 %2531  ;;  %v2616_v25 = vmul.f32 %v2608_v29, %v4305_v34 }
 0xd5c   :  { %v2596_v17 = vsel %vm289_vm1, %v3570_v59, %v2532_v5 }
 0xd5d   :  { %v2556_v2 = vpop.permute.xlu1 %2555 }
 0xd5e   :  { %v2604_v19 = vsel %vm702_vm2, %v2596_v17, %v2556_v2 }
 0xd5f   :  { %v2530_v18 = vpop.permute.xlu0 %2529 }
 0xd60   :  { %v2595_v36 = vsel %vm289_vm1, %v2500_v60, %v2530_v18 }
 0xd61   :  { %v2580_v20 = vpop.permute.xlu1 %2579 }
 0xd62   :  { %v2612_v22 = vsel %vm1147_vm4, %v2604_v19, %v2580_v20  ;;  %v3218_v20 = vld [vmem:[%s4664_s10 + $0x30] sm:$0xff] }
 0xd63   :  { %v2620_v23 = vmul.f32 %v2612_v22, %v4276_v63  ;;  %v2554_v26 = vpop.permute.xlu0 %2553  ;;  %v3217_v22 = vld [vmem:[%s4664_s10 + $0x28] sm:$0xff] }
 0xd64   :  { %v2603_v27 = vsel %vm702_vm2, %v2595_v36, %v2554_v26  ;;  %v3230_v26 = vld [vmem:[%s4666_s12 + $0x78] sm:$0xff]  ;;  %v3227_v36 = vld [vmem:[%s4666_s12 + $0x60] sm:$0xff] }
 0xd65   :  { %v2520_v31 = vpop.permute.xlu1 %2519  ;;  %3571 = vmatprep.subr.mxu0 %v2620_v23 }
 0xd66   :  { %3572 = vmatpush3.msra.mxu0 %v2620_v23  ;;  %v2590_v24 = vsel %vm289_vm1, %v4492_v45, %v2520_v31  ;;  %v3216_v23 = vld [vmem:[%s4664_s10 + $0x20] sm:$0xff]  ;;  %v3229_v31 = vld [vmem:[%s4666_s12 + $0x70] sm:$0xff] }
 0xd67   :  { %v2578_v41 = vpop.permute.xlu0 %2577 }
 0xd68   :  { %v2611_v63 = vsel %vm1147_vm4, %v2603_v27, %v2578_v41 }
 0xd69   :  { %v2619_v46 = vmul.f32 %v2611_v63, %v4284_v10  ;;  %v2544_v28 = vpop.permute.xlu1 %2543  ;;  %v2617_v10 = vmul.f32 %v2609_v47, %v4296_v21 }
 0xd6a   :  { %v2598_v32 = vsel %vm702_vm2, %v2590_v24, %v2544_v28  ;;  %v3215_v24 = vld [vmem:[#allocation11 + $0x1] ss:$0 sm:$0xff] }
 0xd6b   :  { %3573 = vmatprep.subr.mxu0 %v2619_v46  ;;  %v2570_v52 = vpop.permute.xlu0 %2569 }
 0xd6c   :  { %3574 = vmatpush3.msra.mxu0 %v2619_v46  ;;  %v2607_v15 = vsel %vm1147_vm4, %v2599_v55, %v2570_v52 }
 0xd6d   :  { %v2568_v56 = vpop.permute.xlu1 %2567  ;;  %3575 = vmatprep.subr.mxu0 %v2618_v50  ;;  %v2615_v21 = vmul.f32 %v2607_v15, %v4312_v40  ;;  %v3208_v40 = vld [vmem:[%s4660_s6 + $0x28] sm:$0xff] }
 0xd6e   :  { %3576 = vmatpush3.msra.mxu0 %v2618_v50  ;;  %v2606_v38 = vsel %vm1147_vm4, %v2598_v32, %v2568_v56  ;;  %3594 = vmatprep.subr.mxu1 %v3208_v40 }
 0xd6f   :  { %3577 = vmatprep.subr.mxu0 %v2617_v10  ;;  %v2518_v57 = vpop.permute.xlu0 %2517  ;;  %v2614_v39 = vmul.f32 %v2606_v38, %v4317_v43  ;;  %3595 = vmatpush3.msra.mxu1 %v3208_v40  ;;  %v3207_v43 = vld [vmem:[%s4660_s6 + $0x20] sm:$0xff]  ;;  %s3115_s6 = sshll.u32 %s3966_s21, 4  ;;  %s3116_s6 = int_to_ptr.vmem [resolvable:$true] %s3115_s6 }
 0xd70   :  { %3578 = vmatpush3.msra.mxu0 %v2617_v10  ;;  %v2589_v45 = vsel %vm289_vm1, %v4499_v35, %v2518_v57  ;;  %3596 = vmatprep.subr.mxu1 %v3207_v43  ;;  %v3214_v10 = vld [vmem:[#allocation10 + $0x1] ss:$0 sm:$0xff]  ;;  %s3909_s23 = scalar_lea.vmem %s3116_s6, 256  ;;  %p3914_p4 = scmp.lt.s32.totalorder %s3116_s6, %s3116_s6 }
 0xd71   :  { %3579 = vmatprep.subr.mxu0 %v2616_v25  ;;  %v2566_v59 = vpop.permute.xlu1 %2565  ;;  %3597 = vmatpush3.msra.mxu1 %v3207_v43  ;;  %p3910_p3 = scmp.ne.s32.totalorder %s3116_s6, %s3909_s23  ;;  %p3915_p5 = scmp.lt.s32.totalorder %s3909_s23, %s3909_s23 }
 0xd72   :  { %3580 = vmatpush3.msra.mxu0 %v2616_v25 }
 0xd73   :  { %3581 = vmatprep.subr.mxu0 %v2615_v21  ;;  %v2542_v58 = vpop.permute.xlu0 %2541  ;;  %p3916_p6 = por %p3915_p5, %p3914_p4 }
 0xd74   :  { %v2597_v34 = vsel %vm702_vm2, %v2589_v45, %v2542_v58  ;;  %3582 = vmatpush3.msra.mxu0 %v2615_v21  ;;  %v3225_v45 = vld [vmem:[%s4666_s12 + $0x50] sm:$0xff]  ;;  %v3224_v58 = vld [vmem:[%s4666_s12 + $0x48] sm:$0xff] }
 0xd75   :  { %v2605_v60 = vsel %vm1147_vm4, %v2597_v34, %v2566_v59  ;;  %3583 = vmatprep.subr.mxu0 %v2614_v39  ;;  %v3223_v59 = vld [vmem:[%s4666_s12 + $0x40] sm:$0xff]  ;;  %p3917_p7 = pnand %p3916_p6, %p3910_p3 }
 0xd76   :  { %3584 = vmatpush3.msra.mxu0 %v2614_v39  ;;  %v2613_v61 = vmul.f32 %v2605_v60, %v4324_v49  ;;  %v3211_v49 = vld [vmem:[#allocation8 + $0x1] ss:$0 sm:$0xff]  ;;  %v3226_v39 = vld [vmem:[%s4666_s12 + $0x58] sm:$0xff]  ;;  %v3220_v34 = vld [vmem:[#allocation13 + $0x1] ss:$0 sm:$0xff] }
 0xd78   :  { %3585 = vmatprep.subr.mxu0 %v2613_v61 }
 0xd79   :  { %3586 = vmatpush3.msra.mxu0 %v2613_v61 }
 0xd7a   :  { %3588 = vmatmul.mubr.msk.f32.vlgmr.msra.gmra.mxu0 %vm1164_vm3, %v4329_v54  ;;  %3612 = vmatprep.subr.mxu0 %v3230_v26 }
 0xd7b   :  { %3613 = vmatpush3.msra.mxu0 %v3230_v26 }
 0xd7c   :  { %3614 = vmatprep.subr.mxu0 %v3229_v31 }
 0xd7d   :  { %3615 = vmatpush3.msra.mxu0 %v3229_v31 }
 0xd7e   :  { %3616 = vmatprep.subr.mxu0 %v3228_v33 }
 0xd7f   :  { %3617 = vmatpush3.msra.mxu0 %v3228_v33 }
 0xd80   :  { %3618 = vmatprep.subr.mxu0 %v3227_v36 }
 0xd81   :  { %3619 = vmatpush3.msra.mxu0 %v3227_v36 }
 0xd82   :  { %3620 = vmatprep.subr.mxu0 %v3226_v39 }
 0xd83   :  { %3621 = vmatpush3.msra.mxu0 %v3226_v39 }
 0xd84   :  { %3622 = vmatprep.subr.mxu0 %v3225_v45 }
 0xd85   :  { %3623 = vmatpush3.msra.mxu0 %v3225_v45 }
 0xd86   :  { %3624 = vmatprep.subr.mxu0 %v3224_v58 }
 0xd87   :  { %3625 = vmatpush3.msra.mxu0 %v3224_v58 }
 0xd88   :  { %3626 = vmatprep.subr.mxu0 %v3223_v59 }
 0xd89   :  { %3627 = vmatpush3.msra.mxu0 %v3223_v59 }
 0xe3a   :  { %v3589_v35 = vpop.f32.mrf.mxu0 }
 0xe3c   :  { %v2687_v62 = vpop.f32.mrf.mxu0 }
 0xe3d   :  { %3598 = vmatprep.mubr.msk.f32.mxu1 %vm201_vm0, %v2687_v62 }
 0xe3e   :  { %3599 = vmatmul.mubr.msk.f32.vlgmr.msra.gmra.mxu1 %vm201_vm0, %v3589_v35 }
 0xefe   :  { %v3600_v54 = vpop.f32.mrf.mxu1 }
 0xeff   :  { %v2787_v0 = vadd.f32 %v3600_v54, %v3211_v49 }
 0xf00   :  { %v2781_v1 = vpop.f32.mrf.mxu1 }
 0xf01   :  { %v2791_v6 = vadd.f32 %v2787_v0, %v4408_v4  ;;  %v2782_v7 = vadd.f32 %v3211_v49, %v2781_v1  ;;  %v3231_v49 = vld [vmem:[#allocation14 + $0x1] ss:$0 sm:$0xff] }
 0xf03   :  { %v2790_v8 = vadd.f32 %v2782_v7, %v4406_v3  ;;  %v2799_v9 = vsel %vm201_vm0, %v2791_v6, 0.0  ;;  %v3219_v3 = vld [vmem:[%s4664_s10 + $0x38] sm:$0xff] }
 0xf04   :  { %2800 = vadd.xlane.f32.xlu1 %v2799_v9  ;;  %3601 = vmatprep.subr.mxu1 %v3219_v3 }
 0xf05   :  { %v2796_v11 = vsel %vm201_vm0, %v2790_v8, 0.0  ;;  %3602 = vmatpush3.msra.mxu1 %v3219_v3 }
 0xf06   :  { %2797 = vadd.xlane.f32.xlu0 %v2796_v11  ;;  %3603 = vmatprep.subr.mxu1 %v3218_v20 }
 0xf07   :  { %3604 = vmatpush3.msra.mxu1 %v3218_v20 }
 0xf08   :  { %3605 = vmatprep.subr.mxu1 %v3217_v22 }
 0xf09   :  { %3606 = vmatpush3.msra.mxu1 %v3217_v22 }
 0xf0a   :  { %3607 = vmatprep.subr.mxu1 %v3216_v23 }
 0xf0b   :  { %3608 = vmatpush3.msra.mxu1 %v3216_v23 }
 0xf8d   :  { %v2801_v12 = vpop.xlane.xlu1 %2800 }
 0xf8e   :  { %v2803_v13 = vmul.f32 0.03125, %v2801_v12 }
 0xf8f   :  { %v2798_v14 = vpop.xlane.xlu0 %2797 }
 0xf90   :  { %v2802_v16 = vmul.f32 0.03125, %v2798_v14  ;;  %v2805_v5 = vsub.f32 %v2791_v6, %v2803_v13 }
 0xf92   :  { %v2804_v2 = vsub.f32 %v2790_v8, %v2802_v16  ;;  %v2807_v19 = vmul.f32 %v2805_v5, %v2805_v5  ;;  %v2823_v32 = vmul.f32 %v3214_v10, %v2805_v5 }
 0xf94   :  { %v2806_v17 = vmul.f32 %v2804_v2, %v2804_v2  ;;  %v2811_v4 = vsel %vm201_vm0, %v2807_v19, 0.0  ;;  %v2822_v55 = vmul.f32 %v3214_v10, %v2804_v2 }
 0xf96   :  { %v2808_v18 = vsel %vm201_vm0, %v2806_v17, 0.0 }
 0xf97   :  { %2809 = vadd.xlane.f32.xlu0 %v2808_v18 }
 0xf9b   :  { %2812 = vadd.xlane.f32.xlu0 %v2811_v4 }
0x1020   :  { %v2810_v37 = vpop.xlane.xlu0 %2809 }
0x1021   :  { %v2814_v27 = vmul.f32 0.03125, %v2810_v37 }
0x1023   :  { %v2824_v41 = vadd.f32 1e-05, %v2814_v27 }
0x1024   :  { %v2813_v30 = vpop.xlane.xlu0 %2812 }
0x1025   :  { %3713 = vrsqrt.f32 %v2824_v41  ;;  %v2815_v42 = vmul.f32 0.03125, %v2813_v30  ;;  %vm2828_vm13 = vcmp.eq.f32.partialorder %v2824_v41, inf  ;;  %v2831_v28 = vand.u32 2147483648, %v2824_v41 }
0x1026   :  { %vm2830_vm14 = vcmp.eq.f32.partialorder %v2824_v41, 0.0 }
0x1027   :  { %v2825_v63 = vadd.f32 1e-05, %v2815_v42 }
0x1029   :  { %3715 = vrsqrt.f32 %v2825_v63  ;;  %vm2835_vm15 = vcmp.eq.f32.partialorder %v2825_v63, inf  ;;  %v2838_v52 = vand.u32 2147483648, %v2825_v63  ;;  %vm2837_vm1 = vcmp.eq.f32.partialorder %v2825_v63, 0.0 }
0x1032   :  { %v3714_v44 = vpop.eup %3713 }
0x1033   :  { %v2827_v46 = vmul.f32 %v3714_v44, %v2824_v41 }
0x1035   :  { %v2829_v47 = vsel %vm2828_vm13, %v2824_v41, %v2827_v46 }
0x1036   :  { %v2832_v48 = vsel %vm2830_vm14, %v2831_v28, %v2829_v47  ;;  %v3716_v50 = vpop.eup %3715  ;;  %v3235_v28 = vld [vmem:[%s4668_s14 + $0x1] ss:$0 sm:$0xff] }
0x1037   :  { %3717 = vrcp.f32 %v2832_v48  ;;  %v2834_v51 = vmul.f32 %v3716_v50, %v2825_v63  ;;  %v3236_v50 = vld [vmem:[#allocation16 + $0x1] ss:$0 sm:$0xff] }
0x1039   :  { %v2836_v53 = vsel %vm2835_vm15, %v2825_v63, %v2834_v51 }
0x103a   :  { %v2839_v29 = vsel %vm2837_vm1, %v2838_v52, %v2836_v53 }
0x103b   :  { %3719 = vrcp.f32 %v2839_v29 }
0x1044   :  { %v3718_v56 = vpop.eup %3717 }
0x1045   :  { %v2841_v15 = vmul.f32 %v3718_v56, %v2822_v55 }
0x1047   :  { %v2850_v25 = vadd.f32 %v3215_v24, %v2841_v15 }
0x1048   :  { %v3720_v57 = vpop.eup %3719 }
0x1049   :  { %3609 = vmatprep.mubr.msk.f32.mxu1 %vm201_vm0, %v2850_v25  ;;  %v2843_v38 = vmul.f32 %v3720_v57, %v2823_v32 }
0x104b   :  { %v2851_v21 = vadd.f32 %v3215_v24, %v2843_v38 }
0x104d   :  { %3610 = vmatmul.mubr.msk.f32.vlgmr.msra.gmra.mxu1 %vm201_vm0, %v2851_v21 }
0x110d   :  { %v3611_v60 = vpop.f32.mrf.mxu1 }
0x110e   :  { %v2943_v61 = vadd.f32 %v3611_v60, %v3220_v34 }
0x110f   :  { %v2937_v40 = vpop.f32.mrf.mxu1 }
0x1110   :  { %v2938_v43 = vadd.f32 %v3220_v34, %v2937_v40  ;;  %v2947_v62 = vmax.f32 %v2943_v61, 0.0 }
0x1112   :  { %v2946_v35 = vmax.f32 %v2938_v43, 0.0 }
0x1114   :  { %3628 = vmatprep.mubr.msk.f32.mxu0 %vm1164_vm3, %v2946_v35 }
0x1115   :  { %3629 = vmatmul.mubr.msk.f32.vlgmr.msra.gmra.mxu0 %vm1164_vm3, %v2947_v62 }
0x11d5   :  { %v3630_v54 = vpop.f32.mrf.mxu0 }
0x11d6   :  { %v3043_v0 = vadd.f32 %v3630_v54, %v3231_v49 }
0x11d7   :  { %v3037_v1 = vpop.f32.mrf.mxu0 }
0x11d8   :  { %v3047_v6 = vadd.f32 %v3043_v0, %v2851_v21  ;;  %v3038_v7 = vadd.f32 %v3231_v49, %v3037_v1 }
0x11da   :  { %v3046_v8 = vadd.f32 %v3038_v7, %v2850_v25  ;;  %v3055_v9 = vsel %vm201_vm0, %v3047_v6, 0.0 }
0x11db   :  { %3056 = vadd.xlane.f32.xlu0 %v3055_v9 }
0x11dc   :  { %v3052_v11 = vsel %vm201_vm0, %v3046_v8, 0.0 }
0x11dd   :  { %3053 = vadd.xlane.f32.xlu1 %v3052_v11 }
0x1264   :  { %v3057_v12 = vpop.xlane.xlu0 %3056 }
0x1265   :  { %v3059_v13 = vmul.f32 0.03125, %v3057_v12 }
0x1266   :  { %v3054_v14 = vpop.xlane.xlu1 %3053 }
0x1267   :  { %v3061_v16 = vsub.f32 %v3047_v6, %v3059_v13  ;;  %v3058_v5 = vmul.f32 0.03125, %v3054_v14 }
0x1269   :  { %v3060_v2 = vsub.f32 %v3046_v8, %v3058_v5  ;;  %v3063_v17 = vmul.f32 %v3061_v16, %v3061_v16  ;;  %v3079_v47 = vmul.f32 %v3235_v28, %v3061_v16 }
0x126b   :  { %v3067_v18 = vsel %vm201_vm0, %v3063_v17, 0.0  ;;  %v3062_v19 = vmul.f32 %v3060_v2, %v3060_v2  ;;  %v3078_v52 = vmul.f32 %v3235_v28, %v3060_v2 }
0x126c   :  { %3068 = vadd.xlane.f32.xlu0 %v3067_v18 }
0x126d   :  { %v3064_v4 = vsel %vm201_vm0, %v3062_v19, 0.0 }
0x126e   :  { %3065 = vadd.xlane.f32.xlu1 %v3064_v4 }
0x12f5   :  { %v3069_v3 = vpop.xlane.xlu0 %3068 }
0x12f6   :  { %v3071_v20 = vmul.f32 0.03125, %v3069_v3 }
0x12f7   :  { %v3066_v22 = vpop.xlane.xlu1 %3065 }
0x12f8   :  { %v3081_v23 = vadd.f32 1e-05, %v3071_v20  ;;  %v3070_v26 = vmul.f32 0.03125, %v3066_v22 }
0x12fa   :  { %3721 = vrsqrt.f32 %v3081_v23  ;;  %v3080_v31 = vadd.f32 1e-05, %v3070_v26  ;;  %vm3091_vm2 = vcmp.eq.f32.partialorder %v3081_v23, inf  ;;  %v3094_v37 = vand.u32 2147483648, %v3081_v23 }
0x12fb   :  { %vm3093_vm3 = vcmp.eq.f32.partialorder %v3081_v23, 0.0 }
0x12fc   :  { %3723 = vrsqrt.f32 %v3080_v31  ;;  %vm3084_vm4 = vcmp.eq.f32.partialorder %v3080_v31, inf  ;;  %v3087_v63 = vand.u32 2147483648, %v3080_v31  ;;  %vm3086_vm5 = vcmp.eq.f32.partialorder %v3080_v31, 0.0 }
0x1307   :  { %v3722_v33 = vpop.eup %3721 }
0x1308   :  { %v3090_v36 = vmul.f32 %v3722_v33, %v3081_v23 }
0x1309   :  { %v3724_v27 = vpop.eup %3723 }
0x130a   :  { %v3092_v41 = vsel %vm3091_vm2, %v3081_v23, %v3090_v36  ;;  %v3083_v42 = vmul.f32 %v3724_v27, %v3080_v31 }
0x130b   :  { %v3095_v30 = vsel %vm3093_vm3, %v3094_v37, %v3092_v41 }
0x130c   :  { %3725 = vrcp.f32 %v3095_v30  ;;  %v3085_v44 = vsel %vm3084_vm4, %v3080_v31, %v3083_v42 }
0x130d   :  { %v3088_v46 = vsel %vm3086_vm5, %v3087_v63, %v3085_v44 }
0x130e   :  { %3727 = vrcp.f32 %v3088_v46 }
0x1319   :  { %v3726_v48 = vpop.eup %3725 }
0x131a   :  { %v3099_v51 = vmul.f32 %v3726_v48, %v3079_v47 }
0x131b   :  { %v3728_v53 = vpop.eup %3727 }
0x131c   :  { %v3107_v29 = vadd.f32 %v3236_v50, %v3099_v51  ;;  %v3097_v10 = vmul.f32 %v3728_v53, %v3078_v52 }
0x131e   :  { %3109 = vst.msk [vmem:[#allocation17 + $0x8] sm:$0xff] %vm201_vm0, %v3107_v29  ;;  %v3106_v55 = vadd.f32 %v3236_v50, %v3097_v10 }
0x1320   :  { %3108 = vst.msk [vmem:[#allocation17] sm:$0xff] %vm201_vm0, %v3106_v55 }
0x1321   :  { %3920 = shalt.err (!%p3917_p7)
}
0x1322   :  { %3121 = dma.vmem_to_hbm [thread:$0]  %s3116_s6, 256, %s4670_s16, [#allocation4], %s3943_s26, %s3943_s26, %s3944_s27  }
0x1323   :  { %3939 = dma.done.wait [#allocation4], 256  }
0x1324   :  { %3940 = vsyncadd [#allocation4], 4294967040 }
0x1325   :  { %3125 = vsyncpa [#allocation3], 1 }
0x1326   :  { %3126 = vsyncpa [#allocation6], 1 }
0x1327   :  { %3127 = vsyncpa [#allocation9], 1 }
0x1328   :  { %3128 = vsyncpa [#allocation12], 1 }
0x1329   :  { %3129 = vsyncpa [#allocation15], 1 }
0x132a   :  { %3130 = vsyncpa [#allocation4], 1 }

</bundles_post_ra>
